<compile_context>
chip_gen: v7x
topology: tpu7x:2x2x1
jax: 0.10.0
libtpu: 0.0.40
codegen_flags: <defaults>
</compile_context>

<pallas_src>
import jax
import jax.numpy as jnp
from jax import lax
from jax.experimental import pallas as pl
from jax.experimental.pallas import tpu as pltpu

# ---- small, module-consistent shapes -------------------------------------------------
B, F, H, V, L, C = 8, 16, 32, 16, 8, 16   # batch, features, hidden, vocab, max_len, n_classes

SENDER_ENTROPY_COEFF = 0.1
RECEIVER_ENTROPY_COEFF = 0.01   # receiver is deterministic -> its entropy term is exactly 0
LENGTH_COST = 0.02
BASELINE = 0.0                  # BoundedMeanBaseline.predict() on a fresh baseline

# lane-dense output slab layout (single (B, 128) f32 block == one vreg tile, one unmasked store)
SLAB = 128
COL_ENT = 0                  # [0, L)        per-step sender entropy
COL_MSG = L                  # [L, 2L)       message symbols (as f32, cast back in wrapper)
COL_RECV = 2 * L             # [2L, 2L+C)    receiver output logits
COL_LOSS = 2 * L + C         # per-sample cross-entropy loss
COL_ACC = COL_LOSS + 1       # per-sample accuracy
COL_LEN = COL_ACC + 1        # message length
COL_OPT = COL_LEN + 1        # optimized_loss (same scalar broadcast to every row)
PAD = SLAB - (COL_OPT + 1)

# packed-weight row offsets (all multiples of 8 sublanes for f32)
R_WIN = 0                    # W_in            (F, H)
R_WSYM = R_WIN + F           # W_sym = E@W_eh  (V, H)
R_WHH = R_WSYM + V           # W_hh            (H, H)
R_ER = R_WHH + H             # E_r             (V, H)
R_WHHR = R_ER + V            # W_hh_r          (H, H)
R_END = R_WHHR + H           # total rows = 112


# ---------------------------------------------------------------------------------------
# Fused kernel: sender RNN + interleaved receiver RNN -> loss_fn -> REINFORCE mechanics
# ---------------------------------------------------------------------------------------
def _fused_kernel(x_ref, labels_ref, wh_ref, wo_ref, out_ref):
    # ---- hoisted weight / input loads (static ref slices, zero-cost views) -------------
    w_in = wh_ref[R_WIN:R_WSYM, :]       # (F, H)
    w_sym = wh_ref[R_WSYM:R_WHH, :]      # (V, H)  == E @ W_eh (folded at init)
    w_hh = wh_ref[R_WHH:R_ER, :]         # (H, H)
    e_r = wh_ref[R_ER:R_WHHR, :]         # (V, H)
    w_hh_r = wh_ref[R_WHHR:R_END, :]     # (H, H)
    w_out = wo_ref[0:H, :]               # (H, V)
    w_out_r = wo_ref[H:2 * H, :]         # (H, C)
    x = x_ref[...]                       # (B, F)
    labels = labels_ref[...]             # (B, 1) int32

    col_V = lax.broadcasted_iota(jnp.int32, (B, V), 1)
    col_C = lax.broadcasted_iota(jnp.int32, (B, C), 1)

    # ---- recurrent state ----------------------------------------------------------------
    h = jnp.dot(x, w_in, preferred_element_type=jnp.float32)   # sender h0, (B, H)
    in_contrib = jnp.zeros((B, H), jnp.float32)                 # onehot_prev @ W_sym (SOS -> 0)
    h_r = jnp.zeros((B, H), jnp.float32)                        # receiver hidden
    selected = jnp.zeros((B, H), jnp.float32)                   # receiver hidden at EOS position

    eff_ent = jnp.zeros((B, 1), jnp.float32)
    eff_logp = jnp.zeros((B, 1), jnp.float32)
    lengths_f = jnp.zeros((B, 1), jnp.float32)                  # == find_lengths(message)
    alive = jnp.ones((B, 1), jnp.bool_)                         # not-yet-EOSed mask

    ent_cols, msg_cols = [], []

    for t in range(L):  # static unroll over max_len (L = 8)
        # ---- sender step: h = tanh(e@W_eh + h@W_hh) with e@W_eh folded into onehot@W_sym
        h = jnp.tanh(in_contrib + jnp.dot(h, w_hh, preferred_element_type=jnp.float32))
        logits = jnp.dot(h, w_out, preferred_element_type=jnp.float32)      # (B, V)

        m = jnp.max(logits, axis=1, keepdims=True)
        z = logits - m
        ez = jnp.exp(z)
        sum_ez = jnp.sum(ez, axis=1, keepdims=True)
        log_sum = jnp.log(sum_ez)
        probs = ez / sum_ez                                      # exact divide (entropy path)
        logprobs = z - log_sum
        step_ent = -jnp.sum(probs * logprobs, axis=1, keepdims=True)        # (B, 1)

        # greedy symbol (first argmax) -- deterministic stand-in for Categorical sampling
        sym = jnp.min(jnp.where(logits == m, col_V, V), axis=1, keepdims=True)   # (B, 1) int32
        onehot = (col_V == sym).astype(jnp.float32)                          # (B, V)
        step_logp = -log_sum                                     # z[argmax] == 0 exactly
        in_contrib = jnp.dot(onehot, w_sym, preferred_element_type=jnp.float32)

        # ---- REINFORCE masking / find_lengths, accumulated in-loop -----------------------
        alive_f = alive.astype(jnp.float32)
        eff_ent = eff_ent + step_ent * alive_f
        eff_logp = eff_logp + step_logp * alive_f
        lengths_f = lengths_f + alive_f

        # ---- receiver step interleaved (independent h_r chain hides under sender latency)
        h_r = jnp.tanh(jnp.dot(onehot, e_r, preferred_element_type=jnp.float32)
                       + jnp.dot(h_r, w_hh_r, preferred_element_type=jnp.float32))
        is_eos = sym == 0
        sel = alive if t == L - 1 else jnp.logical_and(alive, is_eos)
        selected = jnp.where(sel, h_r, selected)
        alive = jnp.logical_and(alive, jnp.logical_not(is_eos))

        ent_cols.append(step_ent)
        msg_cols.append(sym.astype(jnp.float32))

    # ---------------- receiver readout (RnnReceiverDeterministic, channel_type=None) ------
    recv = jnp.dot(selected, w_out_r, preferred_element_type=jnp.float32)    # (B, C)

    # ---------------- loss_fn: per-sample cross entropy + accuracy ------------------------
    mr = jnp.max(recv, axis=1, keepdims=True)
    zr = recv - mr
    lse = jnp.log(jnp.sum(jnp.exp(zr), axis=1, keepdims=True))
    logprobs_r = zr - lse
    lbl_onehot = (col_C == labels).astype(jnp.float32)
    loss = -jnp.sum(logprobs_r * lbl_onehot, axis=1, keepdims=True)          # (B, 1)
    pred = jnp.min(jnp.where(recv == mr, col_C, C), axis=1, keepdims=True)
    acc = (pred == labels).astype(jnp.float32)                               # (B, 1)

    # ---------------- REINFORCE mechanics (deterministic receiver terms dropped: == 0) ----
    inv_b = 1.0 / float(B)
    eff_ent_n = eff_ent / lengths_f
    weighted_entropy = (jnp.sum(eff_ent_n) * inv_b) * SENDER_ENTROPY_COEFF
    length_loss = lengths_f * LENGTH_COST
    policy_length_loss = jnp.sum(length_loss * eff_logp) * inv_b
    policy_loss = jnp.sum((loss - BASELINE) * eff_logp) * inv_b
    optimized = policy_length_loss + policy_loss - weighted_entropy          # scalar

    # ---------------- single lane-dense slab store -----------------------------------------
    opt_col = jnp.zeros((B, 1), jnp.float32) + optimized
    pad = jnp.zeros((B, PAD), jnp.float32)
    slab = jnp.concatenate(
        ent_cols + msg_cols + [recv, loss, acc, lengths_f, opt_col, pad], axis=1)  # (B, 128)
    out_ref[...] = slab


def pack_params(params):
    """Fold E@W_eh once and row-stack the weights into two VMEM-friendly slabs (done at init)."""
    w_sym = jnp.dot(params["E"], params["W_eh"])                              # (V, H)
    w_h = jnp.concatenate(
        [params["W_in"], w_sym, params["W_hh"], params["E_r"], params["W_hh_r"]], axis=0)  # (112, H)
    w_o = jnp.concatenate([params["W_out"], params["W_out_r"]], axis=0)       # (2H, V) [V == C]
    return w_h, w_o


# ---------------------------------------------------------------------------------------
# Full SenderReceiverRnnReinforce.forward (jit'ed: one dispatch, one fused kernel)
# ---------------------------------------------------------------------------------------
@jax.jit
def sender_receiver_rnn_reinforce(sender_input, labels, w_h, w_o):
    slab = pl.pallas_call(
        _fused_kernel,
        out_shape=jax.ShapeDtypeStruct((B, SLAB), jnp.float32),
        in_specs=[pl.BlockSpec(memory_space=pltpu.MemorySpace.VMEM)] * 4,
        out_specs=pl.BlockSpec(memory_space=pltpu.MemorySpace.VMEM),
    )(sender_input, labels[:, None].astype(jnp.int32), w_h, w_o)

    entropy_s = slab[:, COL_ENT:COL_ENT + L]
    message = slab[:, COL_MSG:COL_MSG + L].astype(jnp.int32)
    receiver_output = slab[:, COL_RECV:COL_RECV + C]
    loss = slab[:, COL_LOSS]
    acc = slab[:, COL_ACC]
    message_length = slab[:, COL_LEN]
    optimized_loss = slab[0, COL_OPT]
    entropy_r = jnp.zeros((B,), jnp.float32)

    interaction = {
        "sender_input": sender_input,
        "labels": labels,
        "message": message,
        "receiver_output": receiver_output,
        "message_length": message_length,
        "aux": {
            "acc": acc,
            "reinf_sg": loss,
            "baseline": jnp.float32(BASELINE),
            "sender_entropy": entropy_s,
            "receiver_entropy": entropy_r,
            "length": message_length,
        },
    }
    return optimized_loss, interaction


def init_params(key):
    ks = jax.random.split(key, 8)
    s = 0.3
    return {
        "W_in":    s * jax.random.normal(ks[0], (F, H), jnp.float32),
        "W_eh":    s * jax.random.normal(ks[1], (H, H), jnp.float32),
        "W_hh":    s * jax.random.normal(ks[2], (H, H), jnp.float32),
        "W_out":   s * jax.random.normal(ks[3], (H, V), jnp.float32),
        "E":       s * jax.random.normal(ks[4], (V, H), jnp.float32),
        "E_r":     s * jax.random.normal(ks[5], (V, H), jnp.float32),
        "W_hh_r":  s * jax.random.normal(ks[6], (H, H), jnp.float32),
        "W_out_r": s * jax.random.normal(ks[7], (H, C), jnp.float32),
    }


if __name__ == "__main__":
    key = jax.random.PRNGKey(0)
    k_param, k_x, k_y = jax.random.split(key, 3)
    params = init_params(k_param)
    w_h, w_o = pack_params(params)   # once, outside the per-call jit path
    sender_input = jax.random.normal(k_x, (B, F), jnp.float32)
    labels = jax.random.randint(k_y, (B,), 0, C, jnp.int32)

    optimized_loss, interaction = sender_receiver_rnn_reinforce(sender_input, labels, w_h, w_o)
    jax.block_until_ready(optimized_loss)
    jax.block_until_ready(interaction["message"])
    print("KERNEL_OK")
</pallas_src>

<mosaic_0001>
module attributes {stable_mosaic.version = 11 : i64} {
  func.func @_fused_kernel(%arg0: memref<8x16xf32, #tpu.memory_space<vmem>>, %arg1: memref<8x1xi32, #tpu.memory_space<vmem>>, %arg2: memref<112x32xf32, #tpu.memory_space<vmem>>, %arg3: memref<64x16xf32, #tpu.memory_space<vmem>>, %arg4: memref<8x128xf32, #tpu.memory_space<vmem>>) attributes {dimension_semantics = [], scalar_prefetch = 0 : i64, scratch_operands = 0 : i64, tpu.core_type = #tpu.core_type<tc>} {
    %c0 = arith.constant 0 : index
    %c0_0 = arith.constant 0 : index
    %0 = vector.load %arg2[%c0, %c0_0] : memref<112x32xf32, #tpu.memory_space<vmem>>, vector<16x32xf32>
    %c16 = arith.constant 16 : index
    %c0_1 = arith.constant 0 : index
    %1 = vector.load %arg2[%c16, %c0_1] : memref<112x32xf32, #tpu.memory_space<vmem>>, vector<16x32xf32>
    %c32 = arith.constant 32 : index
    %c0_2 = arith.constant 0 : index
    %2 = vector.load %arg2[%c32, %c0_2] : memref<112x32xf32, #tpu.memory_space<vmem>>, vector<32x32xf32>
    %c64 = arith.constant 64 : index
    %c0_3 = arith.constant 0 : index
    %3 = vector.load %arg2[%c64, %c0_3] : memref<112x32xf32, #tpu.memory_space<vmem>>, vector<16x32xf32>
    %c80 = arith.constant 80 : index
    %c0_4 = arith.constant 0 : index
    %4 = vector.load %arg2[%c80, %c0_4] : memref<112x32xf32, #tpu.memory_space<vmem>>, vector<32x32xf32>
    %c0_5 = arith.constant 0 : index
    %c0_6 = arith.constant 0 : index
    %5 = vector.load %arg3[%c0_5, %c0_6] : memref<64x16xf32, #tpu.memory_space<vmem>>, vector<32x16xf32>
    %c32_7 = arith.constant 32 : index
    %c0_8 = arith.constant 0 : index
    %6 = vector.load %arg3[%c32_7, %c0_8] : memref<64x16xf32, #tpu.memory_space<vmem>>, vector<32x16xf32>
    %c0_9 = arith.constant 0 : index
    %c0_10 = arith.constant 0 : index
    %7 = vector.load %arg0[%c0_9, %c0_10] : memref<8x16xf32, #tpu.memory_space<vmem>>, vector<8x16xf32>
    %c0_11 = arith.constant 0 : index
    %c0_12 = arith.constant 0 : index
    %8 = vector.load %arg1[%c0_11, %c0_12] : memref<8x1xi32, #tpu.memory_space<vmem>>, vector<8x1xi32>
    %9 = tpu.iota {dimensions = array<i32: 1>} : vector<8x16xi32>
    %10 = tpu.iota {dimensions = array<i32: 1>} : vector<8x16xi32>
    %cst = arith.constant dense<0.000000e+00> : vector<8x32xf32>
    %11 = tpu.matmul %7, %0, %cst {dimension_numbers = #tpu.dot_dimension_numbers<[1], [0], [0], [1], [0, 0, 1, 1], [], []>} : vector<8x16xf32>, vector<16x32xf32>, vector<8x32xf32> -> vector<8x32xf32>
    %cst_13 = arith.constant 0.000000e+00 : f32
    %12 = vector.broadcast %cst_13 : f32 to vector<8x32xf32>
    %cst_14 = arith.constant 0.000000e+00 : f32
    %13 = vector.broadcast %cst_14 : f32 to vector<8x32xf32>
    %cst_15 = arith.constant 0.000000e+00 : f32
    %14 = vector.broadcast %cst_15 : f32 to vector<8x32xf32>
    %cst_16 = arith.constant 0.000000e+00 : f32
    %15 = vector.broadcast %cst_16 : f32 to vector<8x1xf32>
    %cst_17 = arith.constant 0.000000e+00 : f32
    %16 = vector.broadcast %cst_17 : f32 to vector<8x1xf32>
    %cst_18 = arith.constant 0.000000e+00 : f32
    %17 = vector.broadcast %cst_18 : f32 to vector<8x1xf32>
    %true = arith.constant true
    %18 = vector.broadcast %true : i1 to vector<8x1xi1>
    %cst_19 = arith.constant dense<0.000000e+00> : vector<8x32xf32>
    %19 = tpu.matmul %11, %2, %cst_19 {dimension_numbers = #tpu.dot_dimension_numbers<[1], [0], [0], [1], [0, 0, 1, 1], [], []>} : vector<8x32xf32>, vector<32x32xf32>, vector<8x32xf32> -> vector<8x32xf32>
    %20 = arith.addf %12, %19 : vector<8x32xf32>
    %21 = math.tanh %20 : vector<8x32xf32>
    %cst_20 = arith.constant dense<0.000000e+00> : vector<8x16xf32>
    %22 = tpu.matmul %21, %5, %cst_20 {dimension_numbers = #tpu.dot_dimension_numbers<[1], [0], [0], [1], [0, 0, 1, 1], [], []>} : vector<8x32xf32>, vector<32x16xf32>, vector<8x16xf32> -> vector<8x16xf32>
    %cst_21 = arith.constant dense<0xFF800000> : vector<8xf32>
    %23 = vector.multi_reduction <maximumf>, %22, %cst_21 [1] : vector<8x16xf32> to vector<8xf32>
    %24 = vector.shape_cast %23 : vector<8xf32> to vector<8x1xf32>
    %25 = vector.broadcast %24 : vector<8x1xf32> to vector<8x16xf32>
    %26 = arith.subf %22, %25 : vector<8x16xf32>
    %27 = math.exp %26 : vector<8x16xf32>
    %cst_22 = arith.constant dense<0.000000e+00> : vector<8xf32>
    %28 = vector.multi_reduction <add>, %27, %cst_22 [1] : vector<8x16xf32> to vector<8xf32>
    %29 = vector.shape_cast %28 : vector<8xf32> to vector<8x1xf32>
    %30 = math.log %29 : vector<8x1xf32>
    %31 = vector.broadcast %29 : vector<8x1xf32> to vector<8x16xf32>
    %32 = arith.divf %27, %31 : vector<8x16xf32>
    %33 = vector.broadcast %30 : vector<8x1xf32> to vector<8x16xf32>
    %34 = arith.subf %26, %33 : vector<8x16xf32>
    %35 = arith.mulf %32, %34 : vector<8x16xf32>
    %cst_23 = arith.constant dense<0.000000e+00> : vector<8xf32>
    %36 = vector.multi_reduction <add>, %35, %cst_23 [1] : vector<8x16xf32> to vector<8xf32>
    %37 = vector.shape_cast %36 : vector<8xf32> to vector<8x1xf32>
    %cst_24 = arith.constant 0.000000e+00 : f32
    %38 = vector.broadcast %cst_24 : f32 to vector<8x1xf32>
    %39 = arith.subf %38, %37 : vector<8x1xf32>
    %40 = vector.broadcast %24 : vector<8x1xf32> to vector<8x16xf32>
    %41 = arith.cmpf oeq, %22, %40 : vector<8x16xf32>
    %c16_i32 = arith.constant 16 : i32
    %42 = vector.broadcast %c16_i32 : i32 to vector<8x16xi32>
    %43 = arith.select %41, %9, %42 : vector<8x16xi1>, vector<8x16xi32>
    %cst_25 = arith.constant dense<2147483647> : vector<8xi32>
    %44 = vector.multi_reduction <minsi>, %43, %cst_25 [1] : vector<8x16xi32> to vector<8xi32>
    %45 = vector.shape_cast %44 : vector<8xi32> to vector<8x1xi32>
    %46 = vector.broadcast %45 : vector<8x1xi32> to vector<8x16xi32>
    %47 = arith.cmpi eq, %9, %46 : vector<8x16xi32>
    %48 = arith.extui %47 : vector<8x16xi1> to vector<8x16xi32>
    %49 = arith.sitofp %48 : vector<8x16xi32> to vector<8x16xf32>
    %cst_26 = arith.constant 0.000000e+00 : f32
    %50 = vector.broadcast %cst_26 : f32 to vector<8x1xf32>
    %51 = arith.subf %50, %30 : vector<8x1xf32>
    %cst_27 = arith.constant dense<0.000000e+00> : vector<8x32xf32>
    %52 = tpu.matmul %49, %1, %cst_27 {dimension_numbers = #tpu.dot_dimension_numbers<[1], [0], [0], [1], [0, 0, 1, 1], [], []>} : vector<8x16xf32>, vector<16x32xf32>, vector<8x32xf32> -> vector<8x32xf32>
    %53 = arith.extui %18 : vector<8x1xi1> to vector<8x1xi32>
    %54 = arith.sitofp %53 : vector<8x1xi32> to vector<8x1xf32>
    %55 = arith.mulf %39, %54 : vector<8x1xf32>
    %56 = arith.addf %15, %55 : vector<8x1xf32>
    %57 = arith.mulf %51, %54 : vector<8x1xf32>
    %58 = arith.addf %16, %57 : vector<8x1xf32>
    %59 = arith.addf %17, %54 : vector<8x1xf32>
    %cst_28 = arith.constant dense<0.000000e+00> : vector<8x32xf32>
    %60 = tpu.matmul %49, %3, %cst_28 {dimension_numbers = #tpu.dot_dimension_numbers<[1], [0], [0], [1], [0, 0, 1, 1], [], []>} : vector<8x16xf32>, vector<16x32xf32>, vector<8x32xf32> -> vector<8x32xf32>
    %cst_29 = arith.constant dense<0.000000e+00> : vector<8x32xf32>
    %61 = tpu.matmul %13, %4, %cst_29 {dimension_numbers = #tpu.dot_dimension_numbers<[1], [0], [0], [1], [0, 0, 1, 1], [], []>} : vector<8x32xf32>, vector<32x32xf32>, vector<8x32xf32> -> vector<8x32xf32>
    %62 = arith.addf %60, %61 : vector<8x32xf32>
    %63 = math.tanh %62 : vector<8x32xf32>
    %c0_i32 = arith.constant 0 : i32
    %64 = vector.broadcast %c0_i32 : i32 to vector<8x1xi32>
    %65 = arith.cmpi eq, %45, %64 : vector<8x1xi32>
    %66 = arith.andi %18, %65 : vector<8x1xi1>
    %67 = vector.shape_cast %66 : vector<8x1xi1> to vector<8x1xi1>
    %68 = vector.broadcast %67 : vector<8x1xi1> to vector<8x32xi1>
    %69 = arith.select %68, %63, %14 : vector<8x32xi1>, vector<8x32xf32>
    %cst_30 = arith.constant dense<true> : vector<8x1xi1>
    %70 = arith.xori %65, %cst_30 : vector<8x1xi1>
    %71 = arith.andi %18, %70 : vector<8x1xi1>
    %72 = arith.sitofp %45 : vector<8x1xi32> to vector<8x1xf32>
    %cst_31 = arith.constant dense<0.000000e+00> : vector<8x32xf32>
    %73 = tpu.matmul %21, %2, %cst_31 {dimension_numbers = #tpu.dot_dimension_numbers<[1], [0], [0], [1], [0, 0, 1, 1], [], []>} : vector<8x32xf32>, vector<32x32xf32>, vector<8x32xf32> -> vector<8x32xf32>
    %74 = arith.addf %52, %73 : vector<8x32xf32>
    %75 = math.tanh %74 : vector<8x32xf32>
    %cst_32 = arith.constant dense<0.000000e+00> : vector<8x16xf32>
    %76 = tpu.matmul %75, %5, %cst_32 {dimension_numbers = #tpu.dot_dimension_numbers<[1], [0], [0], [1], [0, 0, 1, 1], [], []>} : vector<8x32xf32>, vector<32x16xf32>, vector<8x16xf32> -> vector<8x16xf32>
    %cst_33 = arith.constant dense<0xFF800000> : vector<8xf32>
    %77 = vector.multi_reduction <maximumf>, %76, %cst_33 [1] : vector<8x16xf32> to vector<8xf32>
    %78 = vector.shape_cast %77 : vector<8xf32> to vector<8x1xf32>
    %79 = vector.broadcast %78 : vector<8x1xf32> to vector<8x16xf32>
    %80 = arith.subf %76, %79 : vector<8x16xf32>
    %81 = math.exp %80 : vector<8x16xf32>
    %cst_34 = arith.constant dense<0.000000e+00> : vector<8xf32>
    %82 = vector.multi_reduction <add>, %81, %cst_34 [1] : vector<8x16xf32> to vector<8xf32>
    %83 = vector.shape_cast %82 : vector<8xf32> to vector<8x1xf32>
    %84 = math.log %83 : vector<8x1xf32>
    %85 = vector.broadcast %83 : vector<8x1xf32> to vector<8x16xf32>
    %86 = arith.divf %81, %85 : vector<8x16xf32>
    %87 = vector.broadcast %84 : vector<8x1xf32> to vector<8x16xf32>
    %88 = arith.subf %80, %87 : vector<8x16xf32>
    %89 = arith.mulf %86, %88 : vector<8x16xf32>
    %cst_35 = arith.constant dense<0.000000e+00> : vector<8xf32>
    %90 = vector.multi_reduction <add>, %89, %cst_35 [1] : vector<8x16xf32> to vector<8xf32>
    %91 = vector.shape_cast %90 : vector<8xf32> to vector<8x1xf32>
    %cst_36 = arith.constant 0.000000e+00 : f32
    %92 = vector.broadcast %cst_36 : f32 to vector<8x1xf32>
    %93 = arith.subf %92, %91 : vector<8x1xf32>
    %94 = vector.broadcast %78 : vector<8x1xf32> to vector<8x16xf32>
    %95 = arith.cmpf oeq, %76, %94 : vector<8x16xf32>
    %c16_i32_37 = arith.constant 16 : i32
    %96 = vector.broadcast %c16_i32_37 : i32 to vector<8x16xi32>
    %97 = arith.select %95, %9, %96 : vector<8x16xi1>, vector<8x16xi32>
    %cst_38 = arith.constant dense<2147483647> : vector<8xi32>
    %98 = vector.multi_reduction <minsi>, %97, %cst_38 [1] : vector<8x16xi32> to vector<8xi32>
    %99 = vector.shape_cast %98 : vector<8xi32> to vector<8x1xi32>
    %100 = vector.broadcast %99 : vector<8x1xi32> to vector<8x16xi32>
    %101 = arith.cmpi eq, %9, %100 : vector<8x16xi32>
    %102 = arith.extui %101 : vector<8x16xi1> to vector<8x16xi32>
    %103 = arith.sitofp %102 : vector<8x16xi32> to vector<8x16xf32>
    %cst_39 = arith.constant 0.000000e+00 : f32
    %104 = vector.broadcast %cst_39 : f32 to vector<8x1xf32>
    %105 = arith.subf %104, %84 : vector<8x1xf32>
    %cst_40 = arith.constant dense<0.000000e+00> : vector<8x32xf32>
    %106 = tpu.matmul %103, %1, %cst_40 {dimension_numbers = #tpu.dot_dimension_numbers<[1], [0], [0], [1], [0, 0, 1, 1], [], []>} : vector<8x16xf32>, vector<16x32xf32>, vector<8x32xf32> -> vector<8x32xf32>
    %107 = arith.extui %71 : vector<8x1xi1> to vector<8x1xi32>
    %108 = arith.sitofp %107 : vector<8x1xi32> to vector<8x1xf32>
    %109 = arith.mulf %93, %108 : vector<8x1xf32>
    %110 = arith.addf %56, %109 : vector<8x1xf32>
    %111 = arith.mulf %105, %108 : vector<8x1xf32>
    %112 = arith.addf %58, %111 : vector<8x1xf32>
    %113 = arith.addf %59, %108 : vector<8x1xf32>
    %cst_41 = arith.constant dense<0.000000e+00> : vector<8x32xf32>
    %114 = tpu.matmul %103, %3, %cst_41 {dimension_numbers = #tpu.dot_dimension_numbers<[1], [0], [0], [1], [0, 0, 1, 1], [], []>} : vector<8x16xf32>, vector<16x32xf32>, vector<8x32xf32> -> vector<8x32xf32>
    %cst_42 = arith.constant dense<0.000000e+00> : vector<8x32xf32>
    %115 = tpu.matmul %63, %4, %cst_42 {dimension_numbers = #tpu.dot_dimension_numbers<[1], [0], [0], [1], [0, 0, 1, 1], [], []>} : vector<8x32xf32>, vector<32x32xf32>, vector<8x32xf32> -> vector<8x32xf32>
    %116 = arith.addf %114, %115 : vector<8x32xf32>
    %117 = math.tanh %116 : vector<8x32xf32>
    %c0_i32_43 = arith.constant 0 : i32
    %118 = vector.broadcast %c0_i32_43 : i32 to vector<8x1xi32>
    %119 = arith.cmpi eq, %99, %118 : vector<8x1xi32>
    %120 = arith.andi %71, %119 : vector<8x1xi1>
    %121 = vector.shape_cast %120 : vector<8x1xi1> to vector<8x1xi1>
    %122 = vector.broadcast %121 : vector<8x1xi1> to vector<8x32xi1>
    %123 = arith.select %122, %117, %69 : vector<8x32xi1>, vector<8x32xf32>
    %cst_44 = arith.constant dense<true> : vector<8x1xi1>
    %124 = arith.xori %119, %cst_44 : vector<8x1xi1>
    %125 = arith.andi %71, %124 : vector<8x1xi1>
    %126 = arith.sitofp %99 : vector<8x1xi32> to vector<8x1xf32>
    %cst_45 = arith.constant dense<0.000000e+00> : vector<8x32xf32>
    %127 = tpu.matmul %75, %2, %cst_45 {dimension_numbers = #tpu.dot_dimension_numbers<[1], [0], [0], [1], [0, 0, 1, 1], [], []>} : vector<8x32xf32>, vector<32x32xf32>, vector<8x32xf32> -> vector<8x32xf32>
    %128 = arith.addf %106, %127 : vector<8x32xf32>
    %129 = math.tanh %128 : vector<8x32xf32>
    %cst_46 = arith.constant dense<0.000000e+00> : vector<8x16xf32>
    %130 = tpu.matmul %129, %5, %cst_46 {dimension_numbers = #tpu.dot_dimension_numbers<[1], [0], [0], [1], [0, 0, 1, 1], [], []>} : vector<8x32xf32>, vector<32x16xf32>, vector<8x16xf32> -> vector<8x16xf32>
    %cst_47 = arith.constant dense<0xFF800000> : vector<8xf32>
    %131 = vector.multi_reduction <maximumf>, %130, %cst_47 [1] : vector<8x16xf32> to vector<8xf32>
    %132 = vector.shape_cast %131 : vector<8xf32> to vector<8x1xf32>
    %133 = vector.broadcast %132 : vector<8x1xf32> to vector<8x16xf32>
    %134 = arith.subf %130, %133 : vector<8x16xf32>
    %135 = math.exp %134 : vector<8x16xf32>
    %cst_48 = arith.constant dense<0.000000e+00> : vector<8xf32>
    %136 = vector.multi_reduction <add>, %135, %cst_48 [1] : vector<8x16xf32> to vector<8xf32>
    %137 = vector.shape_cast %136 : vector<8xf32> to vector<8x1xf32>
    %138 = math.log %137 : vector<8x1xf32>
    %139 = vector.broadcast %137 : vector<8x1xf32> to vector<8x16xf32>
    %140 = arith.divf %135, %139 : vector<8x16xf32>
    %141 = vector.broadcast %138 : vector<8x1xf32> to vector<8x16xf32>
    %142 = arith.subf %134, %141 : vector<8x16xf32>
    %143 = arith.mulf %140, %142 : vector<8x16xf32>
    %cst_49 = arith.constant dense<0.000000e+00> : vector<8xf32>
    %144 = vector.multi_reduction <add>, %143, %cst_49 [1] : vector<8x16xf32> to vector<8xf32>
    %145 = vector.shape_cast %144 : vector<8xf32> to vector<8x1xf32>
    %cst_50 = arith.constant 0.000000e+00 : f32
    %146 = vector.broadcast %cst_50 : f32 to vector<8x1xf32>
    %147 = arith.subf %146, %145 : vector<8x1xf32>
    %148 = vector.broadcast %132 : vector<8x1xf32> to vector<8x16xf32>
    %149 = arith.cmpf oeq, %130, %148 : vector<8x16xf32>
    %c16_i32_51 = arith.constant 16 : i32
    %150 = vector.broadcast %c16_i32_51 : i32 to vector<8x16xi32>
    %151 = arith.select %149, %9, %150 : vector<8x16xi1>, vector<8x16xi32>
    %cst_52 = arith.constant dense<2147483647> : vector<8xi32>
    %152 = vector.multi_reduction <minsi>, %151, %cst_52 [1] : vector<8x16xi32> to vector<8xi32>
    %153 = vector.shape_cast %152 : vector<8xi32> to vector<8x1xi32>
    %154 = vector.broadcast %153 : vector<8x1xi32> to vector<8x16xi32>
    %155 = arith.cmpi eq, %9, %154 : vector<8x16xi32>
    %156 = arith.extui %155 : vector<8x16xi1> to vector<8x16xi32>
    %157 = arith.sitofp %156 : vector<8x16xi32> to vector<8x16xf32>
    %cst_53 = arith.constant 0.000000e+00 : f32
    %158 = vector.broadcast %cst_53 : f32 to vector<8x1xf32>
    %159 = arith.subf %158, %138 : vector<8x1xf32>
    %cst_54 = arith.constant dense<0.000000e+00> : vector<8x32xf32>
    %160 = tpu.matmul %157, %1, %cst_54 {dimension_numbers = #tpu.dot_dimension_numbers<[1], [0], [0], [1], [0, 0, 1, 1], [], []>} : vector<8x16xf32>, vector<16x32xf32>, vector<8x32xf32> -> vector<8x32xf32>
    %161 = arith.extui %125 : vector<8x1xi1> to vector<8x1xi32>
    %162 = arith.sitofp %161 : vector<8x1xi32> to vector<8x1xf32>
    %163 = arith.mulf %147, %162 : vector<8x1xf32>
    %164 = arith.addf %110, %163 : vector<8x1xf32>
    %165 = arith.mulf %159, %162 : vector<8x1xf32>
    %166 = arith.addf %112, %165 : vector<8x1xf32>
    %167 = arith.addf %113, %162 : vector<8x1xf32>
    %cst_55 = arith.constant dense<0.000000e+00> : vector<8x32xf32>
    %168 = tpu.matmul %157, %3, %cst_55 {dimension_numbers = #tpu.dot_dimension_numbers<[1], [0], [0], [1], [0, 0, 1, 1], [], []>} : vector<8x16xf32>, vector<16x32xf32>, vector<8x32xf32> -> vector<8x32xf32>
    %cst_56 = arith.constant dense<0.000000e+00> : vector<8x32xf32>
    %169 = tpu.matmul %117, %4, %cst_56 {dimension_numbers = #tpu.dot_dimension_numbers<[1], [0], [0], [1], [0, 0, 1, 1], [], []>} : vector<8x32xf32>, vector<32x32xf32>, vector<8x32xf32> -> vector<8x32xf32>
    %170 = arith.addf %168, %169 : vector<8x32xf32>
    %171 = math.tanh %170 : vector<8x32xf32>
    %c0_i32_57 = arith.constant 0 : i32
    %172 = vector.broadcast %c0_i32_57 : i32 to vector<8x1xi32>
    %173 = arith.cmpi eq, %153, %172 : vector<8x1xi32>
    %174 = arith.andi %125, %173 : vector<8x1xi1>
    %175 = vector.shape_cast %174 : vector<8x1xi1> to vector<8x1xi1>
    %176 = vector.broadcast %175 : vector<8x1xi1> to vector<8x32xi1>
    %177 = arith.select %176, %171, %123 : vector<8x32xi1>, vector<8x32xf32>
    %cst_58 = arith.constant dense<true> : vector<8x1xi1>
    %178 = arith.xori %173, %cst_58 : vector<8x1xi1>
    %179 = arith.andi %125, %178 : vector<8x1xi1>
    %180 = arith.sitofp %153 : vector<8x1xi32> to vector<8x1xf32>
    %cst_59 = arith.constant dense<0.000000e+00> : vector<8x32xf32>
    %181 = tpu.matmul %129, %2, %cst_59 {dimension_numbers = #tpu.dot_dimension_numbers<[1], [0], [0], [1], [0, 0, 1, 1], [], []>} : vector<8x32xf32>, vector<32x32xf32>, vector<8x32xf32> -> vector<8x32xf32>
    %182 = arith.addf %160, %181 : vector<8x32xf32>
    %183 = math.tanh %182 : vector<8x32xf32>
    %cst_60 = arith.constant dense<0.000000e+00> : vector<8x16xf32>
    %184 = tpu.matmul %183, %5, %cst_60 {dimension_numbers = #tpu.dot_dimension_numbers<[1], [0], [0], [1], [0, 0, 1, 1], [], []>} : vector<8x32xf32>, vector<32x16xf32>, vector<8x16xf32> -> vector<8x16xf32>
    %cst_61 = arith.constant dense<0xFF800000> : vector<8xf32>
    %185 = vector.multi_reduction <maximumf>, %184, %cst_61 [1] : vector<8x16xf32> to vector<8xf32>
    %186 = vector.shape_cast %185 : vector<8xf32> to vector<8x1xf32>
    %187 = vector.broadcast %186 : vector<8x1xf32> to vector<8x16xf32>
    %188 = arith.subf %184, %187 : vector<8x16xf32>
    %189 = math.exp %188 : vector<8x16xf32>
    %cst_62 = arith.constant dense<0.000000e+00> : vector<8xf32>
    %190 = vector.multi_reduction <add>, %189, %cst_62 [1] : vector<8x16xf32> to vector<8xf32>
    %191 = vector.shape_cast %190 : vector<8xf32> to vector<8x1xf32>
    %192 = math.log %191 : vector<8x1xf32>
    %193 = vector.broadcast %191 : vector<8x1xf32> to vector<8x16xf32>
    %194 = arith.divf %189, %193 : vector<8x16xf32>
    %195 = vector.broadcast %192 : vector<8x1xf32> to vector<8x16xf32>
    %196 = arith.subf %188, %195 : vector<8x16xf32>
    %197 = arith.mulf %194, %196 : vector<8x16xf32>
    %cst_63 = arith.constant dense<0.000000e+00> : vector<8xf32>
    %198 = vector.multi_reduction <add>, %197, %cst_63 [1] : vector<8x16xf32> to vector<8xf32>
    %199 = vector.shape_cast %198 : vector<8xf32> to vector<8x1xf32>
    %cst_64 = arith.constant 0.000000e+00 : f32
    %200 = vector.broadcast %cst_64 : f32 to vector<8x1xf32>
    %201 = arith.subf %200, %199 : vector<8x1xf32>
    %202 = vector.broadcast %186 : vector<8x1xf32> to vector<8x16xf32>
    %203 = arith.cmpf oeq, %184, %202 : vector<8x16xf32>
    %c16_i32_65 = arith.constant 16 : i32
    %204 = vector.broadcast %c16_i32_65 : i32 to vector<8x16xi32>
    %205 = arith.select %203, %9, %204 : vector<8x16xi1>, vector<8x16xi32>
    %cst_66 = arith.constant dense<2147483647> : vector<8xi32>
    %206 = vector.multi_reduction <minsi>, %205, %cst_66 [1] : vector<8x16xi32> to vector<8xi32>
    %207 = vector.shape_cast %206 : vector<8xi32> to vector<8x1xi32>
    %208 = vector.broadcast %207 : vector<8x1xi32> to vector<8x16xi32>
    %209 = arith.cmpi eq, %9, %208 : vector<8x16xi32>
    %210 = arith.extui %209 : vector<8x16xi1> to vector<8x16xi32>
    %211 = arith.sitofp %210 : vector<8x16xi32> to vector<8x16xf32>
    %cst_67 = arith.constant 0.000000e+00 : f32
    %212 = vector.broadcast %cst_67 : f32 to vector<8x1xf32>
    %213 = arith.subf %212, %192 : vector<8x1xf32>
    %cst_68 = arith.constant dense<0.000000e+00> : vector<8x32xf32>
    %214 = tpu.matmul %211, %1, %cst_68 {dimension_numbers = #tpu.dot_dimension_numbers<[1], [0], [0], [1], [0, 0, 1, 1], [], []>} : vector<8x16xf32>, vector<16x32xf32>, vector<8x32xf32> -> vector<8x32xf32>
    %215 = arith.extui %179 : vector<8x1xi1> to vector<8x1xi32>
    %216 = arith.sitofp %215 : vector<8x1xi32> to vector<8x1xf32>
    %217 = arith.mulf %201, %216 : vector<8x1xf32>
    %218 = arith.addf %164, %217 : vector<8x1xf32>
    %219 = arith.mulf %213, %216 : vector<8x1xf32>
    %220 = arith.addf %166, %219 : vector<8x1xf32>
    %221 = arith.addf %167, %216 : vector<8x1xf32>
    %cst_69 = arith.constant dense<0.000000e+00> : vector<8x32xf32>
    %222 = tpu.matmul %211, %3, %cst_69 {dimension_numbers = #tpu.dot_dimension_numbers<[1], [0], [0], [1], [0, 0, 1, 1], [], []>} : vector<8x16xf32>, vector<16x32xf32>, vector<8x32xf32> -> vector<8x32xf32>
    %cst_70 = arith.constant dense<0.000000e+00> : vector<8x32xf32>
    %223 = tpu.matmul %171, %4, %cst_70 {dimension_numbers = #tpu.dot_dimension_numbers<[1], [0], [0], [1], [0, 0, 1, 1], [], []>} : vector<8x32xf32>, vector<32x32xf32>, vector<8x32xf32> -> vector<8x32xf32>
    %224 = arith.addf %222, %223 : vector<8x32xf32>
    %225 = math.tanh %224 : vector<8x32xf32>
    %c0_i32_71 = arith.constant 0 : i32
    %226 = vector.broadcast %c0_i32_71 : i32 to vector<8x1xi32>
    %227 = arith.cmpi eq, %207, %226 : vector<8x1xi32>
    %228 = arith.andi %179, %227 : vector<8x1xi1>
    %229 = vector.shape_cast %228 : vector<8x1xi1> to vector<8x1xi1>
    %230 = vector.broadcast %229 : vector<8x1xi1> to vector<8x32xi1>
    %231 = arith.select %230, %225, %177 : vector<8x32xi1>, vector<8x32xf32>
    %cst_72 = arith.constant dense<true> : vector<8x1xi1>
    %232 = arith.xori %227, %cst_72 : vector<8x1xi1>
    %233 = arith.andi %179, %232 : vector<8x1xi1>
    %234 = arith.sitofp %207 : vector<8x1xi32> to vector<8x1xf32>
    %cst_73 = arith.constant dense<0.000000e+00> : vector<8x32xf32>
    %235 = tpu.matmul %183, %2, %cst_73 {dimension_numbers = #tpu.dot_dimension_numbers<[1], [0], [0], [1], [0, 0, 1, 1], [], []>} : vector<8x32xf32>, vector<32x32xf32>, vector<8x32xf32> -> vector<8x32xf32>
    %236 = arith.addf %214, %235 : vector<8x32xf32>
    %237 = math.tanh %236 : vector<8x32xf32>
    %cst_74 = arith.constant dense<0.000000e+00> : vector<8x16xf32>
    %238 = tpu.matmul %237, %5, %cst_74 {dimension_numbers = #tpu.dot_dimension_numbers<[1], [0], [0], [1], [0, 0, 1, 1], [], []>} : vector<8x32xf32>, vector<32x16xf32>, vector<8x16xf32> -> vector<8x16xf32>
    %cst_75 = arith.constant dense<0xFF800000> : vector<8xf32>
    %239 = vector.multi_reduction <maximumf>, %238, %cst_75 [1] : vector<8x16xf32> to vector<8xf32>
    %240 = vector.shape_cast %239 : vector<8xf32> to vector<8x1xf32>
    %241 = vector.broadcast %240 : vector<8x1xf32> to vector<8x16xf32>
    %242 = arith.subf %238, %241 : vector<8x16xf32>
    %243 = math.exp %242 : vector<8x16xf32>
    %cst_76 = arith.constant dense<0.000000e+00> : vector<8xf32>
    %244 = vector.multi_reduction <add>, %243, %cst_76 [1] : vector<8x16xf32> to vector<8xf32>
    %245 = vector.shape_cast %244 : vector<8xf32> to vector<8x1xf32>
    %246 = math.log %245 : vector<8x1xf32>
    %247 = vector.broadcast %245 : vector<8x1xf32> to vector<8x16xf32>
    %248 = arith.divf %243, %247 : vector<8x16xf32>
    %249 = vector.broadcast %246 : vector<8x1xf32> to vector<8x16xf32>
    %250 = arith.subf %242, %249 : vector<8x16xf32>
    %251 = arith.mulf %248, %250 : vector<8x16xf32>
    %cst_77 = arith.constant dense<0.000000e+00> : vector<8xf32>
    %252 = vector.multi_reduction <add>, %251, %cst_77 [1] : vector<8x16xf32> to vector<8xf32>
    %253 = vector.shape_cast %252 : vector<8xf32> to vector<8x1xf32>
    %cst_78 = arith.constant 0.000000e+00 : f32
    %254 = vector.broadcast %cst_78 : f32 to vector<8x1xf32>
    %255 = arith.subf %254, %253 : vector<8x1xf32>
    %256 = vector.broadcast %240 : vector<8x1xf32> to vector<8x16xf32>
    %257 = arith.cmpf oeq, %238, %256 : vector<8x16xf32>
    %c16_i32_79 = arith.constant 16 : i32
    %258 = vector.broadcast %c16_i32_79 : i32 to vector<8x16xi32>
    %259 = arith.select %257, %9, %258 : vector<8x16xi1>, vector<8x16xi32>
    %cst_80 = arith.constant dense<2147483647> : vector<8xi32>
    %260 = vector.multi_reduction <minsi>, %259, %cst_80 [1] : vector<8x16xi32> to vector<8xi32>
    %261 = vector.shape_cast %260 : vector<8xi32> to vector<8x1xi32>
    %262 = vector.broadcast %261 : vector<8x1xi32> to vector<8x16xi32>
    %263 = arith.cmpi eq, %9, %262 : vector<8x16xi32>
    %264 = arith.extui %263 : vector<8x16xi1> to vector<8x16xi32>
    %265 = arith.sitofp %264 : vector<8x16xi32> to vector<8x16xf32>
    %cst_81 = arith.constant 0.000000e+00 : f32
    %266 = vector.broadcast %cst_81 : f32 to vector<8x1xf32>
    %267 = arith.subf %266, %246 : vector<8x1xf32>
    %cst_82 = arith.constant dense<0.000000e+00> : vector<8x32xf32>
    %268 = tpu.matmul %265, %1, %cst_82 {dimension_numbers = #tpu.dot_dimension_numbers<[1], [0], [0], [1], [0, 0, 1, 1], [], []>} : vector<8x16xf32>, vector<16x32xf32>, vector<8x32xf32> -> vector<8x32xf32>
    %269 = arith.extui %233 : vector<8x1xi1> to vector<8x1xi32>
    %270 = arith.sitofp %269 : vector<8x1xi32> to vector<8x1xf32>
    %271 = arith.mulf %255, %270 : vector<8x1xf32>
    %272 = arith.addf %218, %271 : vector<8x1xf32>
    %273 = arith.mulf %267, %270 : vector<8x1xf32>
    %274 = arith.addf %220, %273 : vector<8x1xf32>
    %275 = arith.addf %221, %270 : vector<8x1xf32>
    %cst_83 = arith.constant dense<0.000000e+00> : vector<8x32xf32>
    %276 = tpu.matmul %265, %3, %cst_83 {dimension_numbers = #tpu.dot_dimension_numbers<[1], [0], [0], [1], [0, 0, 1, 1], [], []>} : vector<8x16xf32>, vector<16x32xf32>, vector<8x32xf32> -> vector<8x32xf32>
    %cst_84 = arith.constant dense<0.000000e+00> : vector<8x32xf32>
    %277 = tpu.matmul %225, %4, %cst_84 {dimension_numbers = #tpu.dot_dimension_numbers<[1], [0], [0], [1], [0, 0, 1, 1], [], []>} : vector<8x32xf32>, vector<32x32xf32>, vector<8x32xf32> -> vector<8x32xf32>
    %278 = arith.addf %276, %277 : vector<8x32xf32>
    %279 = math.tanh %278 : vector<8x32xf32>
    %c0_i32_85 = arith.constant 0 : i32
    %280 = vector.broadcast %c0_i32_85 : i32 to vector<8x1xi32>
    %281 = arith.cmpi eq, %261, %280 : vector<8x1xi32>
    %282 = arith.andi %233, %281 : vector<8x1xi1>
    %283 = vector.shape_cast %282 : vector<8x1xi1> to vector<8x1xi1>
    %284 = vector.broadcast %283 : vector<8x1xi1> to vector<8x32xi1>
    %285 = arith.select %284, %279, %231 : vector<8x32xi1>, vector<8x32xf32>
    %cst_86 = arith.constant dense<true> : vector<8x1xi1>
    %286 = arith.xori %281, %cst_86 : vector<8x1xi1>
    %287 = arith.andi %233, %286 : vector<8x1xi1>
    %288 = arith.sitofp %261 : vector<8x1xi32> to vector<8x1xf32>
    %cst_87 = arith.constant dense<0.000000e+00> : vector<8x32xf32>
    %289 = tpu.matmul %237, %2, %cst_87 {dimension_numbers = #tpu.dot_dimension_numbers<[1], [0], [0], [1], [0, 0, 1, 1], [], []>} : vector<8x32xf32>, vector<32x32xf32>, vector<8x32xf32> -> vector<8x32xf32>
    %290 = arith.addf %268, %289 : vector<8x32xf32>
    %291 = math.tanh %290 : vector<8x32xf32>
    %cst_88 = arith.constant dense<0.000000e+00> : vector<8x16xf32>
    %292 = tpu.matmul %291, %5, %cst_88 {dimension_numbers = #tpu.dot_dimension_numbers<[1], [0], [0], [1], [0, 0, 1, 1], [], []>} : vector<8x32xf32>, vector<32x16xf32>, vector<8x16xf32> -> vector<8x16xf32>
    %cst_89 = arith.constant dense<0xFF800000> : vector<8xf32>
    %293 = vector.multi_reduction <maximumf>, %292, %cst_89 [1] : vector<8x16xf32> to vector<8xf32>
    %294 = vector.shape_cast %293 : vector<8xf32> to vector<8x1xf32>
    %295 = vector.broadcast %294 : vector<8x1xf32> to vector<8x16xf32>
    %296 = arith.subf %292, %295 : vector<8x16xf32>
    %297 = math.exp %296 : vector<8x16xf32>
    %cst_90 = arith.constant dense<0.000000e+00> : vector<8xf32>
    %298 = vector.multi_reduction <add>, %297, %cst_90 [1] : vector<8x16xf32> to vector<8xf32>
    %299 = vector.shape_cast %298 : vector<8xf32> to vector<8x1xf32>
    %300 = math.log %299 : vector<8x1xf32>
    %301 = vector.broadcast %299 : vector<8x1xf32> to vector<8x16xf32>
    %302 = arith.divf %297, %301 : vector<8x16xf32>
    %303 = vector.broadcast %300 : vector<8x1xf32> to vector<8x16xf32>
    %304 = arith.subf %296, %303 : vector<8x16xf32>
    %305 = arith.mulf %302, %304 : vector<8x16xf32>
    %cst_91 = arith.constant dense<0.000000e+00> : vector<8xf32>
    %306 = vector.multi_reduction <add>, %305, %cst_91 [1] : vector<8x16xf32> to vector<8xf32>
    %307 = vector.shape_cast %306 : vector<8xf32> to vector<8x1xf32>
    %cst_92 = arith.constant 0.000000e+00 : f32
    %308 = vector.broadcast %cst_92 : f32 to vector<8x1xf32>
    %309 = arith.subf %308, %307 : vector<8x1xf32>
    %310 = vector.broadcast %294 : vector<8x1xf32> to vector<8x16xf32>
    %311 = arith.cmpf oeq, %292, %310 : vector<8x16xf32>
    %c16_i32_93 = arith.constant 16 : i32
    %312 = vector.broadcast %c16_i32_93 : i32 to vector<8x16xi32>
    %313 = arith.select %311, %9, %312 : vector<8x16xi1>, vector<8x16xi32>
    %cst_94 = arith.constant dense<2147483647> : vector<8xi32>
    %314 = vector.multi_reduction <minsi>, %313, %cst_94 [1] : vector<8x16xi32> to vector<8xi32>
    %315 = vector.shape_cast %314 : vector<8xi32> to vector<8x1xi32>
    %316 = vector.broadcast %315 : vector<8x1xi32> to vector<8x16xi32>
    %317 = arith.cmpi eq, %9, %316 : vector<8x16xi32>
    %318 = arith.extui %317 : vector<8x16xi1> to vector<8x16xi32>
    %319 = arith.sitofp %318 : vector<8x16xi32> to vector<8x16xf32>
    %cst_95 = arith.constant 0.000000e+00 : f32
    %320 = vector.broadcast %cst_95 : f32 to vector<8x1xf32>
    %321 = arith.subf %320, %300 : vector<8x1xf32>
    %cst_96 = arith.constant dense<0.000000e+00> : vector<8x32xf32>
    %322 = tpu.matmul %319, %1, %cst_96 {dimension_numbers = #tpu.dot_dimension_numbers<[1], [0], [0], [1], [0, 0, 1, 1], [], []>} : vector<8x16xf32>, vector<16x32xf32>, vector<8x32xf32> -> vector<8x32xf32>
    %323 = arith.extui %287 : vector<8x1xi1> to vector<8x1xi32>
    %324 = arith.sitofp %323 : vector<8x1xi32> to vector<8x1xf32>
    %325 = arith.mulf %309, %324 : vector<8x1xf32>
    %326 = arith.addf %272, %325 : vector<8x1xf32>
    %327 = arith.mulf %321, %324 : vector<8x1xf32>
    %328 = arith.addf %274, %327 : vector<8x1xf32>
    %329 = arith.addf %275, %324 : vector<8x1xf32>
    %cst_97 = arith.constant dense<0.000000e+00> : vector<8x32xf32>
    %330 = tpu.matmul %319, %3, %cst_97 {dimension_numbers = #tpu.dot_dimension_numbers<[1], [0], [0], [1], [0, 0, 1, 1], [], []>} : vector<8x16xf32>, vector<16x32xf32>, vector<8x32xf32> -> vector<8x32xf32>
    %cst_98 = arith.constant dense<0.000000e+00> : vector<8x32xf32>
    %331 = tpu.matmul %279, %4, %cst_98 {dimension_numbers = #tpu.dot_dimension_numbers<[1], [0], [0], [1], [0, 0, 1, 1], [], []>} : vector<8x32xf32>, vector<32x32xf32>, vector<8x32xf32> -> vector<8x32xf32>
    %332 = arith.addf %330, %331 : vector<8x32xf32>
    %333 = math.tanh %332 : vector<8x32xf32>
    %c0_i32_99 = arith.constant 0 : i32
    %334 = vector.broadcast %c0_i32_99 : i32 to vector<8x1xi32>
    %335 = arith.cmpi eq, %315, %334 : vector<8x1xi32>
    %336 = arith.andi %287, %335 : vector<8x1xi1>
    %337 = vector.shape_cast %336 : vector<8x1xi1> to vector<8x1xi1>
    %338 = vector.broadcast %337 : vector<8x1xi1> to vector<8x32xi1>
    %339 = arith.select %338, %333, %285 : vector<8x32xi1>, vector<8x32xf32>
    %cst_100 = arith.constant dense<true> : vector<8x1xi1>
    %340 = arith.xori %335, %cst_100 : vector<8x1xi1>
    %341 = arith.andi %287, %340 : vector<8x1xi1>
    %342 = arith.sitofp %315 : vector<8x1xi32> to vector<8x1xf32>
    %cst_101 = arith.constant dense<0.000000e+00> : vector<8x32xf32>
    %343 = tpu.matmul %291, %2, %cst_101 {dimension_numbers = #tpu.dot_dimension_numbers<[1], [0], [0], [1], [0, 0, 1, 1], [], []>} : vector<8x32xf32>, vector<32x32xf32>, vector<8x32xf32> -> vector<8x32xf32>
    %344 = arith.addf %322, %343 : vector<8x32xf32>
    %345 = math.tanh %344 : vector<8x32xf32>
    %cst_102 = arith.constant dense<0.000000e+00> : vector<8x16xf32>
    %346 = tpu.matmul %345, %5, %cst_102 {dimension_numbers = #tpu.dot_dimension_numbers<[1], [0], [0], [1], [0, 0, 1, 1], [], []>} : vector<8x32xf32>, vector<32x16xf32>, vector<8x16xf32> -> vector<8x16xf32>
    %cst_103 = arith.constant dense<0xFF800000> : vector<8xf32>
    %347 = vector.multi_reduction <maximumf>, %346, %cst_103 [1] : vector<8x16xf32> to vector<8xf32>
    %348 = vector.shape_cast %347 : vector<8xf32> to vector<8x1xf32>
    %349 = vector.broadcast %348 : vector<8x1xf32> to vector<8x16xf32>
    %350 = arith.subf %346, %349 : vector<8x16xf32>
    %351 = math.exp %350 : vector<8x16xf32>
    %cst_104 = arith.constant dense<0.000000e+00> : vector<8xf32>
    %352 = vector.multi_reduction <add>, %351, %cst_104 [1] : vector<8x16xf32> to vector<8xf32>
    %353 = vector.shape_cast %352 : vector<8xf32> to vector<8x1xf32>
    %354 = math.log %353 : vector<8x1xf32>
    %355 = vector.broadcast %353 : vector<8x1xf32> to vector<8x16xf32>
    %356 = arith.divf %351, %355 : vector<8x16xf32>
    %357 = vector.broadcast %354 : vector<8x1xf32> to vector<8x16xf32>
    %358 = arith.subf %350, %357 : vector<8x16xf32>
    %359 = arith.mulf %356, %358 : vector<8x16xf32>
    %cst_105 = arith.constant dense<0.000000e+00> : vector<8xf32>
    %360 = vector.multi_reduction <add>, %359, %cst_105 [1] : vector<8x16xf32> to vector<8xf32>
    %361 = vector.shape_cast %360 : vector<8xf32> to vector<8x1xf32>
    %cst_106 = arith.constant 0.000000e+00 : f32
    %362 = vector.broadcast %cst_106 : f32 to vector<8x1xf32>
    %363 = arith.subf %362, %361 : vector<8x1xf32>
    %364 = vector.broadcast %348 : vector<8x1xf32> to vector<8x16xf32>
    %365 = arith.cmpf oeq, %346, %364 : vector<8x16xf32>
    %c16_i32_107 = arith.constant 16 : i32
    %366 = vector.broadcast %c16_i32_107 : i32 to vector<8x16xi32>
    %367 = arith.select %365, %9, %366 : vector<8x16xi1>, vector<8x16xi32>
    %cst_108 = arith.constant dense<2147483647> : vector<8xi32>
    %368 = vector.multi_reduction <minsi>, %367, %cst_108 [1] : vector<8x16xi32> to vector<8xi32>
    %369 = vector.shape_cast %368 : vector<8xi32> to vector<8x1xi32>
    %370 = vector.broadcast %369 : vector<8x1xi32> to vector<8x16xi32>
    %371 = arith.cmpi eq, %9, %370 : vector<8x16xi32>
    %372 = arith.extui %371 : vector<8x16xi1> to vector<8x16xi32>
    %373 = arith.sitofp %372 : vector<8x16xi32> to vector<8x16xf32>
    %cst_109 = arith.constant 0.000000e+00 : f32
    %374 = vector.broadcast %cst_109 : f32 to vector<8x1xf32>
    %375 = arith.subf %374, %354 : vector<8x1xf32>
    %cst_110 = arith.constant dense<0.000000e+00> : vector<8x32xf32>
    %376 = tpu.matmul %373, %1, %cst_110 {dimension_numbers = #tpu.dot_dimension_numbers<[1], [0], [0], [1], [0, 0, 1, 1], [], []>} : vector<8x16xf32>, vector<16x32xf32>, vector<8x32xf32> -> vector<8x32xf32>
    %377 = arith.extui %341 : vector<8x1xi1> to vector<8x1xi32>
    %378 = arith.sitofp %377 : vector<8x1xi32> to vector<8x1xf32>
    %379 = arith.mulf %363, %378 : vector<8x1xf32>
    %380 = arith.addf %326, %379 : vector<8x1xf32>
    %381 = arith.mulf %375, %378 : vector<8x1xf32>
    %382 = arith.addf %328, %381 : vector<8x1xf32>
    %383 = arith.addf %329, %378 : vector<8x1xf32>
    %cst_111 = arith.constant dense<0.000000e+00> : vector<8x32xf32>
    %384 = tpu.matmul %373, %3, %cst_111 {dimension_numbers = #tpu.dot_dimension_numbers<[1], [0], [0], [1], [0, 0, 1, 1], [], []>} : vector<8x16xf32>, vector<16x32xf32>, vector<8x32xf32> -> vector<8x32xf32>
    %cst_112 = arith.constant dense<0.000000e+00> : vector<8x32xf32>
    %385 = tpu.matmul %333, %4, %cst_112 {dimension_numbers = #tpu.dot_dimension_numbers<[1], [0], [0], [1], [0, 0, 1, 1], [], []>} : vector<8x32xf32>, vector<32x32xf32>, vector<8x32xf32> -> vector<8x32xf32>
    %386 = arith.addf %384, %385 : vector<8x32xf32>
    %387 = math.tanh %386 : vector<8x32xf32>
    %c0_i32_113 = arith.constant 0 : i32
    %388 = vector.broadcast %c0_i32_113 : i32 to vector<8x1xi32>
    %389 = arith.cmpi eq, %369, %388 : vector<8x1xi32>
    %390 = arith.andi %341, %389 : vector<8x1xi1>
    %391 = vector.shape_cast %390 : vector<8x1xi1> to vector<8x1xi1>
    %392 = vector.broadcast %391 : vector<8x1xi1> to vector<8x32xi1>
    %393 = arith.select %392, %387, %339 : vector<8x32xi1>, vector<8x32xf32>
    %cst_114 = arith.constant dense<true> : vector<8x1xi1>
    %394 = arith.xori %389, %cst_114 : vector<8x1xi1>
    %395 = arith.andi %341, %394 : vector<8x1xi1>
    %396 = arith.sitofp %369 : vector<8x1xi32> to vector<8x1xf32>
    %cst_115 = arith.constant dense<0.000000e+00> : vector<8x32xf32>
    %397 = tpu.matmul %345, %2, %cst_115 {dimension_numbers = #tpu.dot_dimension_numbers<[1], [0], [0], [1], [0, 0, 1, 1], [], []>} : vector<8x32xf32>, vector<32x32xf32>, vector<8x32xf32> -> vector<8x32xf32>
    %398 = arith.addf %376, %397 : vector<8x32xf32>
    %399 = math.tanh %398 : vector<8x32xf32>
    %cst_116 = arith.constant dense<0.000000e+00> : vector<8x16xf32>
    %400 = tpu.matmul %399, %5, %cst_116 {dimension_numbers = #tpu.dot_dimension_numbers<[1], [0], [0], [1], [0, 0, 1, 1], [], []>} : vector<8x32xf32>, vector<32x16xf32>, vector<8x16xf32> -> vector<8x16xf32>
    %cst_117 = arith.constant dense<0xFF800000> : vector<8xf32>
    %401 = vector.multi_reduction <maximumf>, %400, %cst_117 [1] : vector<8x16xf32> to vector<8xf32>
    %402 = vector.shape_cast %401 : vector<8xf32> to vector<8x1xf32>
    %403 = vector.broadcast %402 : vector<8x1xf32> to vector<8x16xf32>
    %404 = arith.subf %400, %403 : vector<8x16xf32>
    %405 = math.exp %404 : vector<8x16xf32>
    %cst_118 = arith.constant dense<0.000000e+00> : vector<8xf32>
    %406 = vector.multi_reduction <add>, %405, %cst_118 [1] : vector<8x16xf32> to vector<8xf32>
    %407 = vector.shape_cast %406 : vector<8xf32> to vector<8x1xf32>
    %408 = math.log %407 : vector<8x1xf32>
    %409 = vector.broadcast %407 : vector<8x1xf32> to vector<8x16xf32>
    %410 = arith.divf %405, %409 : vector<8x16xf32>
    %411 = vector.broadcast %408 : vector<8x1xf32> to vector<8x16xf32>
    %412 = arith.subf %404, %411 : vector<8x16xf32>
    %413 = arith.mulf %410, %412 : vector<8x16xf32>
    %cst_119 = arith.constant dense<0.000000e+00> : vector<8xf32>
    %414 = vector.multi_reduction <add>, %413, %cst_119 [1] : vector<8x16xf32> to vector<8xf32>
    %415 = vector.shape_cast %414 : vector<8xf32> to vector<8x1xf32>
    %cst_120 = arith.constant 0.000000e+00 : f32
    %416 = vector.broadcast %cst_120 : f32 to vector<8x1xf32>
    %417 = arith.subf %416, %415 : vector<8x1xf32>
    %418 = vector.broadcast %402 : vector<8x1xf32> to vector<8x16xf32>
    %419 = arith.cmpf oeq, %400, %418 : vector<8x16xf32>
    %c16_i32_121 = arith.constant 16 : i32
    %420 = vector.broadcast %c16_i32_121 : i32 to vector<8x16xi32>
    %421 = arith.select %419, %9, %420 : vector<8x16xi1>, vector<8x16xi32>
    %cst_122 = arith.constant dense<2147483647> : vector<8xi32>
    %422 = vector.multi_reduction <minsi>, %421, %cst_122 [1] : vector<8x16xi32> to vector<8xi32>
    %423 = vector.shape_cast %422 : vector<8xi32> to vector<8x1xi32>
    %424 = vector.broadcast %423 : vector<8x1xi32> to vector<8x16xi32>
    %425 = arith.cmpi eq, %9, %424 : vector<8x16xi32>
    %426 = arith.extui %425 : vector<8x16xi1> to vector<8x16xi32>
    %427 = arith.sitofp %426 : vector<8x16xi32> to vector<8x16xf32>
    %cst_123 = arith.constant 0.000000e+00 : f32
    %428 = vector.broadcast %cst_123 : f32 to vector<8x1xf32>
    %429 = arith.subf %428, %408 : vector<8x1xf32>
    %430 = arith.extui %395 : vector<8x1xi1> to vector<8x1xi32>
    %431 = arith.sitofp %430 : vector<8x1xi32> to vector<8x1xf32>
    %432 = arith.mulf %417, %431 : vector<8x1xf32>
    %433 = arith.addf %380, %432 : vector<8x1xf32>
    %434 = arith.mulf %429, %431 : vector<8x1xf32>
    %435 = arith.addf %382, %434 : vector<8x1xf32>
    %436 = arith.addf %383, %431 : vector<8x1xf32>
    %cst_124 = arith.constant dense<0.000000e+00> : vector<8x32xf32>
    %437 = tpu.matmul %427, %3, %cst_124 {dimension_numbers = #tpu.dot_dimension_numbers<[1], [0], [0], [1], [0, 0, 1, 1], [], []>} : vector<8x16xf32>, vector<16x32xf32>, vector<8x32xf32> -> vector<8x32xf32>
    %cst_125 = arith.constant dense<0.000000e+00> : vector<8x32xf32>
    %438 = tpu.matmul %387, %4, %cst_125 {dimension_numbers = #tpu.dot_dimension_numbers<[1], [0], [0], [1], [0, 0, 1, 1], [], []>} : vector<8x32xf32>, vector<32x32xf32>, vector<8x32xf32> -> vector<8x32xf32>
    %439 = arith.addf %437, %438 : vector<8x32xf32>
    %440 = math.tanh %439 : vector<8x32xf32>
    %441 = vector.shape_cast %395 : vector<8x1xi1> to vector<8x1xi1>
    %442 = vector.broadcast %441 : vector<8x1xi1> to vector<8x32xi1>
    %443 = arith.select %442, %440, %393 : vector<8x32xi1>, vector<8x32xf32>
    %444 = arith.sitofp %423 : vector<8x1xi32> to vector<8x1xf32>
    %cst_126 = arith.constant dense<0.000000e+00> : vector<8x16xf32>
    %445 = tpu.matmul %443, %6, %cst_126 {dimension_numbers = #tpu.dot_dimension_numbers<[1], [0], [0], [1], [0, 0, 1, 1], [], []>} : vector<8x32xf32>, vector<32x16xf32>, vector<8x16xf32> -> vector<8x16xf32>
    %cst_127 = arith.constant dense<0xFF800000> : vector<8xf32>
    %446 = vector.multi_reduction <maximumf>, %445, %cst_127 [1] : vector<8x16xf32> to vector<8xf32>
    %447 = vector.shape_cast %446 : vector<8xf32> to vector<8x1xf32>
    %448 = vector.broadcast %447 : vector<8x1xf32> to vector<8x16xf32>
    %449 = arith.subf %445, %448 : vector<8x16xf32>
    %450 = math.exp %449 : vector<8x16xf32>
    %cst_128 = arith.constant dense<0.000000e+00> : vector<8xf32>
    %451 = vector.multi_reduction <add>, %450, %cst_128 [1] : vector<8x16xf32> to vector<8xf32>
    %452 = vector.shape_cast %451 : vector<8xf32> to vector<8x1xf32>
    %453 = math.log %452 : vector<8x1xf32>
    %454 = vector.broadcast %453 : vector<8x1xf32> to vector<8x16xf32>
    %455 = arith.subf %449, %454 : vector<8x16xf32>
    %456 = vector.broadcast %8 : vector<8x1xi32> to vector<8x16xi32>
    %457 = arith.cmpi eq, %10, %456 : vector<8x16xi32>
    %458 = arith.extui %457 : vector<8x16xi1> to vector<8x16xi32>
    %459 = arith.sitofp %458 : vector<8x16xi32> to vector<8x16xf32>
    %460 = arith.mulf %455, %459 : vector<8x16xf32>
    %cst_129 = arith.constant dense<0.000000e+00> : vector<8xf32>
    %461 = vector.multi_reduction <add>, %460, %cst_129 [1] : vector<8x16xf32> to vector<8xf32>
    %462 = vector.shape_cast %461 : vector<8xf32> to vector<8x1xf32>
    %cst_130 = arith.constant 0.000000e+00 : f32
    %463 = vector.broadcast %cst_130 : f32 to vector<8x1xf32>
    %464 = arith.subf %463, %462 : vector<8x1xf32>
    %465 = vector.broadcast %447 : vector<8x1xf32> to vector<8x16xf32>
    %466 = arith.cmpf oeq, %445, %465 : vector<8x16xf32>
    %c16_i32_131 = arith.constant 16 : i32
    %467 = vector.broadcast %c16_i32_131 : i32 to vector<8x16xi32>
    %468 = arith.select %466, %10, %467 : vector<8x16xi1>, vector<8x16xi32>
    %cst_132 = arith.constant dense<2147483647> : vector<8xi32>
    %469 = vector.multi_reduction <minsi>, %468, %cst_132 [1] : vector<8x16xi32> to vector<8xi32>
    %470 = vector.shape_cast %469 : vector<8xi32> to vector<8x1xi32>
    %471 = arith.cmpi eq, %470, %8 : vector<8x1xi32>
    %472 = arith.extui %471 : vector<8x1xi1> to vector<8x1xi32>
    %473 = arith.sitofp %472 : vector<8x1xi32> to vector<8x1xf32>
    %474 = arith.divf %433, %436 : vector<8x1xf32>
    %475 = vector.shape_cast %474 : vector<8x1xf32> to vector<1x8x1xf32>
    %cst_133 = arith.constant dense<0.000000e+00> : vector<1xf32>
    %476 = vector.multi_reduction <add>, %475, %cst_133 [1, 2] : vector<1x8x1xf32> to vector<1xf32>
    %477 = vector.shape_cast %476 : vector<1xf32> to vector<1x1x1xf32>
    %478 = vector.extract %477[0, 0, 0] : f32 from vector<1x1x1xf32>
    %cst_134 = arith.constant 1.250000e-01 : f32
    %479 = arith.mulf %478, %cst_134 : f32
    %cst_135 = arith.constant 1.000000e-01 : f32
    %480 = arith.mulf %479, %cst_135 : f32
    %cst_136 = arith.constant 2.000000e-02 : f32
    %481 = vector.broadcast %cst_136 : f32 to vector<8x1xf32>
    %482 = arith.mulf %436, %481 : vector<8x1xf32>
    %483 = arith.mulf %482, %435 : vector<8x1xf32>
    %484 = vector.shape_cast %483 : vector<8x1xf32> to vector<1x8x1xf32>
    %cst_137 = arith.constant dense<0.000000e+00> : vector<1xf32>
    %485 = vector.multi_reduction <add>, %484, %cst_137 [1, 2] : vector<1x8x1xf32> to vector<1xf32>
    %486 = vector.shape_cast %485 : vector<1xf32> to vector<1x1x1xf32>
    %487 = vector.extract %486[0, 0, 0] : f32 from vector<1x1x1xf32>
    %cst_138 = arith.constant 1.250000e-01 : f32
    %488 = arith.mulf %487, %cst_138 : f32
    %cst_139 = arith.constant 0.000000e+00 : f32
    %489 = vector.broadcast %cst_139 : f32 to vector<8x1xf32>
    %490 = arith.subf %464, %489 : vector<8x1xf32>
    %491 = arith.mulf %490, %435 : vector<8x1xf32>
    %492 = vector.shape_cast %491 : vector<8x1xf32> to vector<1x8x1xf32>
    %cst_140 = arith.constant dense<0.000000e+00> : vector<1xf32>
    %493 = vector.multi_reduction <add>, %492, %cst_140 [1, 2] : vector<1x8x1xf32> to vector<1xf32>
    %494 = vector.shape_cast %493 : vector<1xf32> to vector<1x1x1xf32>
    %495 = vector.extract %494[0, 0, 0] : f32 from vector<1x1x1xf32>
    %cst_141 = arith.constant 1.250000e-01 : f32
    %496 = arith.mulf %495, %cst_141 : f32
    %497 = arith.addf %488, %496 : f32
    %498 = arith.subf %497, %480 : f32
    %cst_142 = arith.constant 0.000000e+00 : f32
    %499 = vector.broadcast %cst_142 : f32 to vector<8x1xf32>
    %500 = vector.broadcast %498 : f32 to vector<8x1xf32>
    %501 = arith.addf %499, %500 : vector<8x1xf32>
    %cst_143 = arith.constant 0.000000e+00 : f32
    %502 = vector.broadcast %cst_143 : f32 to vector<8x92xf32>
    %503 = tpu.concatenate %39, %93, %147, %201, %255, %309, %363, %417, %72, %126, %180, %234, %288, %342, %396, %444 in 1 : vector<8x1xf32>, vector<8x1xf32>, vector<8x1xf32>, vector<8x1xf32>, vector<8x1xf32>, vector<8x1xf32>, vector<8x1xf32>, vector<8x1xf32>, vector<8x1xf32>, vector<8x1xf32>, vector<8x1xf32>, vector<8x1xf32>, vector<8x1xf32>, vector<8x1xf32>, vector<8x1xf32>, vector<8x1xf32> -> vector<8x16xf32>
    %504 = tpu.concatenate %445, %464, %473, %436, %501, %502 in 1 : vector<8x16xf32>, vector<8x1xf32>, vector<8x1xf32>, vector<8x1xf32>, vector<8x1xf32>, vector<8x92xf32> -> vector<8x112xf32>
    %505 = tpu.concatenate %503, %504 in 1 : vector<8x16xf32>, vector<8x112xf32> -> vector<8x128xf32>
    %c0_144 = arith.constant 0 : index
    %c0_145 = arith.constant 0 : index
    %506 = vector.load %arg4[%c0_144, %c0_145] : memref<8x128xf32, #tpu.memory_space<vmem>>, vector<8x128xf32>
    tpu.vector_store %arg4[%c0_144, %c0_145], %505 {strides = array<i32>} : memref<8x128xf32, #tpu.memory_space<vmem>>, vector<8x128xf32>,
    return
  }
}

</mosaic_0001>

<bundles_post_ra>
// kernel: sender_receiver_rnn_reinforce.1
= control target key start
LH: loop header
LB: loop body
LE: loop exit
PB: predicated region body
PF: predicated region fallthrough
CT: control target
= control target key end

     0   :  { %v4524_v0 = vmov 0.0|0.0   ;;  %vm4525_vm0 = vmmov 0   ;;  %v4526_v3 = vmov 0.0   ;;  %vm43_vm1 = vcmask 130048   ;;  %s4530_s16 = smov 16   ;;  %s5387_s2 = inlined_call_operand.vmem [shape: f32[112,32], index: 2, kind: input, shape index: {}]   ;;  %s5388_s0 = inlined_call_operand.vmem [shape: f32[8,16], index: 0, kind: input, shape index: {}]   ;;  %s5389_s3 = inlined_call_operand.vmem [shape: f32[64,16], index: 3, kind: input, shape index: {}]   ;;  %s5390_s1 = inlined_call_operand.vmem [shape: s32[8,1], index: 1, kind: input, shape index: {}]   ;;  %s5391_s4 = inlined_call_operand.vmem [shape: f32[8,128], index: 4, kind: output, shape index: {}]  }
   0x1   :  { %4196 = vmatprep.subr.bf16.mxu0 %v4524_v0  ;;  %v17_v1 = vld [vmem:[%s5387_s2] sm:$0xff]  ;;  %v18_v2 = vld [vmem:[%s5387_s2 + $0x8] sm:$0xff]  ;;  %3813 = vmatprep.mubr.msk.f32.mxu0 %vm4525_vm0, %v4526_v3  ;;  %v23_v7 = vld [vmem:[%s5387_s2 + $0x30] sm:$0xff]  ;;  %vm117_vm2 = vcmask 261120   ;;  %v41_v26 = vlaneseq  ;;  %vm4527_vm11 = vmmov 1  }
   0x2   :  { %v4197_v4 = vpack.c.bf16 %v18_v2, %v17_v1  ;;  %4199 = vmatprep.subr.bf16.mxu1 %v4524_v0  ;;  %v21_v5 = vld [vmem:[%s5387_s2 + $0x20] sm:$0xff]  ;;  %v22_v6 = vld [vmem:[%s5387_s2 + $0x28] sm:$0xff]  ;;  %3824 = vmatprep.mubr.msk.f32.mxu1 %vm4525_vm0, %v4526_v3  ;;  %v24_v9 = vld [vmem:[%s5387_s2 + $0x38] sm:$0xff] }
   0x3   :  { %v4577_v8 = vpack.c.bf16 %v22_v6, %v21_v5  ;;  %v39_v10 = vld [vmem:[%s5388_s0] sm:$0xff]  ;;  %v4586_v11 = vpack.c.bf16 %v24_v9, %v23_v7  ;;  %v32_v15 = vld [vmem:[%s5389_s3 + $0x8] sm:$0xff]  ;;  %v33_v16 = vld [vmem:[%s5389_s3 + $0x10] sm:$0xff]  ;;  %v4632_v27 = vand.u32 127, %v41_v26 }
   0x4   :  { %4198 = vmatpush3.bf16.msra.mxu0 %v4197_v4  ;;  %v31_v14 = vld [vmem:[%s5389_s3] sm:$0xff]  ;;  %v34_v18 = vld [vmem:[%s5389_s3 + $0x18] sm:$0xff]  ;;  %v27_v33 = vld [vmem:[%s5387_s2 + $0x50] sm:$0xff] }
   0x5   :  { %4201 = vmatpush3.bf16.msra.mxu1 %v4577_v8  ;;  %4205 = vmatprep.subr.bf16.mxu0 %v4524_v0  ;;  %v4607_v17 = vpack.c.bf16 %v32_v15, %v31_v14  ;;  %v4613_v19 = vpack.c.bf16 %v34_v18, %v33_v16  ;;  %v28_v34 = vld [vmem:[%s5387_s2 + $0x58] sm:$0xff]  ;;  %v29_v35 = vld [vmem:[%s5387_s2 + $0x60] sm:$0xff]  ;;  %v30_v37 = vld [vmem:[%s5387_s2 + $0x68] sm:$0xff] }
   0x6   :  { %4202 = vmatprep.subr.bf16.mxu1 %v4524_v0  ;;  %v4649_v36 = vpack.c.bf16 %v28_v34, %v27_v33  ;;  %v19_v38 = vld [vmem:[%s5387_s2 + $0x10] sm:$0xff]  ;;  %v20_v39 = vld [vmem:[%s5387_s2 + $0x18] sm:$0xff]  ;;  %v4663_v41 = vpack.c.bf16 %v30_v37, %v29_v35  ;;  %v25_v46 = vld [vmem:[%s5387_s2 + $0x40] sm:$0xff] }
   0x7   :  { %3814 = vmatmul.mubr.msk.f32.vlgmr.msra.gmra.mrb[0].mxu0 %vm43_vm1, %v39_v10  ;;  %v4660_v40 = vpack.c.bf16 %v20_v39, %v19_v38  ;;  %v26_v47 = vld [vmem:[%s5387_s2 + $0x48] sm:$0xff] }
   0x8   :  { %3835 = vmatprep.mubr.msk.f32.mxu0 %vm4525_vm0, %v4526_v3  ;;  %4207 = vmatpush3.bf16.msra.mxu0 %v4607_v17  ;;  %v4679_v48 = vpack.c.bf16 %v26_v47, %v25_v46 }
   0x9   :  { %4204 = vmatpush3.bf16.msra.mxu1 %v4586_v11  ;;  %4208 = vmatprep.subr.bf16.mxu0 %v4524_v0 }
   0xa   :  { %4211 = vmatprep.subr.bf16.mxu1 %v4524_v0 }
   0xc   :  { %4210 = vmatpush3.bf16.msra.mxu0 %v4613_v19 }
   0xd   :  { %4220 = vmatprep.subr.bf16.mxu0 %v4524_v0 }
  0xda   :  { %v113_v12 = vpop.f32.mrb[0].mxu0 }
  0xdb   :  { %v3815_v13 = vpop.f32.mrb[1].mxu0  ;;  %3825 = vmatmul.mubr.msk.f32.vlgmr.msra.gmra.mrb[0].mxu1 %vm117_vm2, %v113_v12 }
  0xdc   :  { %3846 = vmatprep.mubr.msk.f32.mxu1 %vm4525_vm0, %v4526_v3  ;;  %4213 = vmatpush3.bf16.msra.mxu1 %v4649_v36 }
  0xdd   :  { %4214 = vmatprep.subr.bf16.mxu1 %v4524_v0 }
  0xe0   :  { %4216 = vmatpush3.bf16.msra.mxu1 %v4663_v41 }
  0xe1   :  { %4217 = vmatprep.subr.bf16.mxu1 %v4524_v0 }
  0xe3   :  { %3847 = vmatmul.mubr.f32.vlgmr.msra.gmra.mrb[2].mxu1 %v4526_v3 }
  0xe4   :  { %3853 = vmatprep.mubr.msk.f32.mxu1 %vm4525_vm0, %v4526_v3  ;;  %4219 = vmatpush3.bf16.msra.mxu1 %v4679_v48 }
  0xe5   :  { %4229 = vmatprep.subr.bf16.mxu1 %v4524_v0 }
 0x1ae   :  { %v187_v20 = vpop.f32.mrb[0].mxu1 }
 0x1af   :  { %4438 = vtanh.f32 %v187_v20  ;;  %v3826_v21 = vpop.f32.mrb[1].mxu1 }
 0x1b9   :  { %v4439_v22 = vpop.eup %4438 }
 0x1ba   :  { %3836 = vmatmul.mubr.msk.f32.vlgmr.msra.gmra.mrb[2].mxu0 %vm117_vm2, %v4439_v22 }
 0x1bb   :  { %4222 = vmatpush3.bf16.msra.mxu0 %v4577_v8  ;;  %3864 = vmatprep.mubr.msk.f32.mxu0 %vm4525_vm0, %v4526_v3 }
 0x1bc   :  { %4223 = vmatprep.subr.bf16.mxu0 %v4524_v0 }
 0x1bf   :  { %4225 = vmatpush3.bf16.msra.mxu0 %v4586_v11 }
 0x1c0   :  { %4226 = vmatprep.subr.bf16.mxu0 %v4524_v0 }
 0x1c2   :  { %3865 = vmatmul.mubr.msk.f32.vlgmr.msra.gmra.mrb[4].mxu0 %vm117_vm2, %v4439_v22 }
 0x1c3   :  { %3871 = vmatprep.mubr.msk.f32.mxu0 %vm4525_vm0, %v4526_v3  ;;  %4228 = vmatpush3.bf16.msra.mxu0 %v4660_v40 }
 0x1c4   :  { %4235 = vmatprep.subr.bf16.mxu0 %v4524_v0 }
 0x28d   :  { %v4628_v23 = vpop.f32.mrb[2].mxu0 }
 0x28e   :  { %v3837_v24 = vpop.f32.mrb[3].mxu0  ;;  %v265_v25 = vsel %vm43_vm1, %v4628_v23, -inf }
 0x28f   :  { %266 = vmax.xlane.f32.xlu0 %v265_v25 }
 0x31c   :  { %v4634_v28 = vpop.xlane.xlu0 %266 }
 0x31d   :  { %vm284_vm3 = vcmp.eq.f32.partialorder %v4628_v23, %v4634_v28 }
 0x31e   :  { %v285_v29 = vsel %vm284_vm3, %v4632_v27, 16 }
 0x31f   :  { %v286_v30 = vsel %vm43_vm1, %v285_v29, 2147483647 }
 0x320   :  { %v288_v31 = vshra.s32 %v286_v30, 16  ;;  %v287_v42 = vand.u32 65535, %v286_v30 }
 0x322   :  { %v290_v32 = vcvt.s32.f32 %v288_v31  ;;  %v289_v44 = vcvt.s32.f32 %v287_v42 }
 0x324   :  { %291 = vmin.xlane.f32.xlu0 %v290_v32 }
 0x3b1   :  { %v292_v43 = vpop.xlane.xlu0 %291 }
 0x3b2   :  { %vm293_vm4 = vcmp.eq.f32.partialorder %v290_v32, %v292_v43  ;;  %v298_v49 = vcvt.f32.s32 %v292_v43 }
 0x3b3   :  { %v294_v45 = vsel %vm293_vm4, %v289_v44, inf }
 0x3b4   :  { %295 = vmin.xlane.f32.xlu1 %v294_v45  ;;  %v299_v51 = vshll.u32 %v298_v49, 16 }
 0x441   :  { %v296_v50 = vpop.xlane.xlu1 %295 }
 0x442   :  { %v297_v52 = vcvt.f32.s32 %v296_v50 }
 0x444   :  { %v4683_v53 = vadd.s32 %v299_v51, %v297_v52 }
 0x446   :  { %vm301_vm5 = vcmp.eq.s32.totalorder %v4632_v27, %v4683_v53  ;;  %vm454_vm6 = vcmp.eq.s32.totalorder %v4683_v53, 0 }
 0x447   :  { %v3582_v54 = vsel %vm301_vm5, 1.0, %v4526_v3  ;;  %vm4757_vm12 = vmxor %vm454_vm6, %vm4527_vm11 }
 0x448   :  { %3854 = vmatmul.mubr.msk.f32.vlgmr.msra.gmra.mrb[2].mxu1 %vm43_vm1, %v3582_v54  ;;  %3872 = vmatmul.mubr.msk.f32.vlgmr.msra.gmra.mrb[4].mxu0 %vm43_vm1, %v3582_v54 }
 0x449   :  { %4231 = vmatpush3.bf16.msra.mxu1 %v4607_v17  ;;  %4237 = vmatpush3.bf16.msra.mxu0 %v4649_v36 }
 0x44a   :  { %4232 = vmatprep.subr.bf16.mxu1 %v4524_v0  ;;  %4238 = vmatprep.subr.bf16.mxu0 %v4524_v0 }
 0x44b   :  { %3882 = vmatprep.mubr.msk.f32.mxu1 %vm4525_vm0, %v4526_v3  ;;  %3893 = vmatprep.mubr.msk.f32.mxu0 %vm4525_vm0, %v4526_v3 }
 0x44d   :  { %4234 = vmatpush3.bf16.msra.mxu1 %v4613_v19  ;;  %4240 = vmatpush3.bf16.msra.mxu0 %v4663_v41 }
 0x44e   :  { %4244 = vmatprep.subr.bf16.mxu1 %v4524_v0  ;;  %4241 = vmatprep.subr.bf16.mxu0 %v4524_v0 }
 0x51b   :  { %v449_v55 = vpop.f32.mrb[2].mxu1  ;;  %v596_v56 = vpop.f32.mrb[4].mxu0 }
 0x51c   :  { %4440 = vtanh.f32 %v449_v55  ;;  %v3855_v57 = vpop.f32.mrb[3].mxu1  ;;  %v3873_v58 = vpop.f32.mrb[5].mxu0 }
 0x51d   :  { %4442 = vtanh.f32 %v596_v56 }
 0x526   :  { %v4441_v59 = vpop.eup %4440 }
 0x527   :  { %v4443_v60 = vpop.eup %4442  ;;  %v4705_v61 = vsel %vm454_vm6, %v4441_v59, 0.0  ;;  %3894 = vmatmul.mubr.msk.f32.vlgmr.msra.gmra.mrb[6].mxu0 %vm117_vm2, %v4441_v59 }
 0x528   :  { %3883 = vmatmul.mubr.msk.f32.vlgmr.msra.gmra.mrb[4].mxu1 %vm117_vm2, %v4443_v60  ;;  %4243 = vmatpush3.bf16.msra.mxu0 %v4679_v48 }
 0x529   :  { %4246 = vmatpush3.bf16.msra.mxu1 %v4577_v8  ;;  %3911 = vmatprep.mubr.msk.f32.mxu1 %vm4525_vm0, %v4526_v3 }
 0x52a   :  { %4247 = vmatprep.subr.bf16.mxu1 %v4524_v0  ;;  %3900 = vmatprep.mubr.msk.f32.mxu0 %vm4525_vm0, %v4526_v3 }
 0x52b   :  { %4253 = vmatprep.subr.bf16.mxu0 %v4524_v0 }
 0x52d   :  { %4249 = vmatpush3.bf16.msra.mxu1 %v4586_v11 }
 0x52e   :  { %4250 = vmatprep.subr.bf16.mxu1 %v4524_v0 }
 0x530   :  { %3912 = vmatmul.mubr.msk.f32.vlgmr.msra.gmra.mrb[6].mxu1 %vm117_vm2, %v4443_v60 }
 0x531   :  { %4252 = vmatpush3.bf16.msra.mxu1 %v4660_v40  ;;  %3918 = vmatprep.mubr.msk.f32.mxu1 %vm4525_vm0, %v4526_v3 }
 0x532   :  { %4259 = vmatprep.subr.bf16.mxu1 %v4524_v0 }
 0x5fb   :  { %v4724_v62 = vpop.f32.mrb[4].mxu1 }
 0x5fc   :  { %v3884_v63 = vpop.f32.mrb[5].mxu1  ;;  %v674_v1 = vsel %vm43_vm1, %v4724_v62, -inf }
 0x5fd   :  { %675 = vmax.xlane.f32.xlu1 %v674_v1 }
 0x68a   :  { %v4728_v2 = vpop.xlane.xlu1 %675 }
 0x68b   :  { %vm693_vm7 = vcmp.eq.f32.partialorder %v4724_v62, %v4728_v2 }
 0x68c   :  { %v694_v4 = vsel %vm693_vm7, %v4632_v27, 16 }
 0x68d   :  { %v695_v5 = vsel %vm43_vm1, %v694_v4, 2147483647 }
 0x68e   :  { %v697_v6 = vshra.s32 %v695_v5, 16  ;;  %v696_v9 = vand.u32 65535, %v695_v5 }
 0x690   :  { %v699_v7 = vcvt.s32.f32 %v697_v6  ;;  %v698_v12 = vcvt.s32.f32 %v696_v9 }
 0x692   :  { %700 = vmin.xlane.f32.xlu0 %v699_v7 }
 0x71f   :  { %v701_v10 = vpop.xlane.xlu0 %700 }
 0x720   :  { %vm702_vm8 = vcmp.eq.f32.partialorder %v699_v7, %v701_v10  ;;  %v707_v14 = vcvt.f32.s32 %v701_v10 }
 0x721   :  { %v703_v13 = vsel %vm702_vm8, %v698_v12, inf }
 0x722   :  { %704 = vmin.xlane.f32.xlu1 %v703_v13  ;;  %v708_v16 = vshll.u32 %v707_v14, 16 }
 0x7af   :  { %v705_v15 = vpop.xlane.xlu1 %704 }
 0x7b0   :  { %v706_v18 = vcvt.f32.s32 %v705_v15  ;;  %v4528_v15 = vmov 0  }
 0x7b1   :  { %4437 = vset.pattern.permute.xlu0 %v4528_v15 }
 0x7b2   :  { %v4734_v20 = vadd.s32 %v708_v16, %v706_v18 }
 0x7b4   :  { %vm710_vm9 = vcmp.eq.s32.totalorder %v4632_v27, %v4734_v20  ;;  %vm868_vm10 = vcmp.eq.s32.totalorder %v4734_v20, 0 }
 0x7b5   :  { %v3587_v21 = vsel %vm710_vm9, 1.0, %v4526_v3  ;;  %vm4767_vm13 = vmand %vm4757_vm12, %vm868_vm10 }
 0x7b6   :  { %3901 = vmatmul.mubr.msk.f32.vlgmr.msra.gmra.mrb[6].mxu0 %vm43_vm1, %v3587_v21  ;;  %3919 = vmatmul.mubr.msk.f32.vlgmr.msra.gmra.mrb[6].mxu1 %vm43_vm1, %v3587_v21  ;;  %vm873_vm4 = vmxor %vm868_vm10, %vm4527_vm11 }
 0x7b7   :  { %4255 = vmatpush3.bf16.msra.mxu0 %v4607_v17  ;;  %4261 = vmatpush3.bf16.msra.mxu1 %v4649_v36  ;;  %vm4828_vm6 = vmand %vm4757_vm12, %vm873_vm4 }
 0x7b8   :  { %4256 = vmatprep.subr.bf16.mxu0 %v4524_v0  ;;  %4262 = vmatprep.subr.bf16.mxu1 %v4524_v0 }
 0x7b9   :  { %3929 = vmatprep.mubr.msk.f32.mxu0 %vm4525_vm0, %v4526_v3  ;;  %3940 = vmatprep.mubr.msk.f32.mxu1 %vm4525_vm0, %v4526_v3 }
 0x7bb   :  { %4258 = vmatpush3.bf16.msra.mxu0 %v4613_v19  ;;  %4264 = vmatpush3.bf16.msra.mxu1 %v4663_v41 }
 0x7bc   :  { %4268 = vmatprep.subr.bf16.mxu0 %v4524_v0  ;;  %4265 = vmatprep.subr.bf16.mxu1 %v4524_v0 }
 0x889   :  { %v863_v22 = vpop.f32.mrb[6].mxu0  ;;  %v1012_v24 = vpop.f32.mrb[6].mxu1 }
 0x88a   :  { %4444 = vtanh.f32 %v863_v22  ;;  %v3902_v25 = vpop.f32.mrb[7].mxu0  ;;  %v3920_v26 = vpop.f32.mrb[7].mxu1 }
 0x88b   :  { %4446 = vtanh.f32 %v1012_v24 }
 0x894   :  { %v4761_v30 = vpop.eup %4444 }
 0x895   :  { %v4447_v32 = vpop.eup %4446  ;;  %3941 = vmatmul.mubr.msk.f32.vlgmr.msra.gmra.mrb[8].mxu1 %vm117_vm2, %v4761_v30  ;;  %v872_v33 = vsel %vm4767_vm13, %v4761_v30, %v4705_v61 }
 0x896   :  { %3930 = vmatmul.mubr.msk.f32.vlgmr.msra.gmra.mrb[8].mxu0 %vm117_vm2, %v4447_v32  ;;  %4267 = vmatpush3.bf16.msra.mxu1 %v4679_v48 }
 0x897   :  { %4270 = vmatpush3.bf16.msra.mxu0 %v4577_v8  ;;  %3958 = vmatprep.mubr.msk.f32.mxu0 %vm4525_vm0, %v4526_v3 }
 0x898   :  { %4271 = vmatprep.subr.bf16.mxu0 %v4524_v0  ;;  %3947 = vmatprep.mubr.msk.f32.mxu1 %vm4525_vm0, %v4526_v3 }
 0x899   :  { %4277 = vmatprep.subr.bf16.mxu1 %v4524_v0 }
 0x89b   :  { %4273 = vmatpush3.bf16.msra.mxu0 %v4586_v11 }
 0x89c   :  { %4274 = vmatprep.subr.bf16.mxu0 %v4524_v0 }
 0x89e   :  { %3959 = vmatmul.mubr.msk.f32.vlgmr.msra.gmra.mrb[10].mxu0 %vm117_vm2, %v4447_v32 }
 0x89f   :  { %4276 = vmatpush3.bf16.msra.mxu0 %v4660_v40  ;;  %3965 = vmatprep.mubr.msk.f32.mxu0 %vm4525_vm0, %v4526_v3 }
 0x8a0   :  { %4283 = vmatprep.subr.bf16.mxu0 %v4524_v0 }
 0x969   :  { %v4793_v34 = vpop.f32.mrb[8].mxu0 }
 0x96a   :  { %v3931_v35 = vpop.f32.mrb[9].mxu0  ;;  %v1090_v37 = vsel %vm43_vm1, %v4793_v34, -inf }
 0x96b   :  { %1091 = vmax.xlane.f32.xlu0 %v1090_v37 }
 0x9f8   :  { %v4797_v38 = vpop.xlane.xlu0 %1091 }
 0x9f9   :  { %vm1109_vm14 = vcmp.eq.f32.partialorder %v4793_v34, %v4797_v38 }
 0x9fa   :  { %v1110_v39 = vsel %vm1109_vm14, %v4632_v27, 16 }
 0x9fb   :  { %v1111_v42 = vsel %vm43_vm1, %v1110_v39, 2147483647 }
 0x9fc   :  { %v1113_v43 = vshra.s32 %v1111_v42, 16  ;;  %v1112_v45 = vand.u32 65535, %v1111_v42 }
 0x9fe   :  { %v1115_v44 = vcvt.s32.f32 %v1113_v43  ;;  %v1114_v47 = vcvt.s32.f32 %v1112_v45 }
 0xa00   :  { %1116 = vmin.xlane.f32.xlu1 %v1115_v44 }
 0xa8d   :  { %v1117_v46 = vpop.xlane.xlu1 %1116 }
 0xa8e   :  { %vm1118_vm15 = vcmp.eq.f32.partialorder %v1115_v44, %v1117_v46  ;;  %v1123_v50 = vcvt.f32.s32 %v1117_v46 }
 0xa8f   :  { %v1119_v49 = vsel %vm1118_vm15, %v1114_v47, inf }
 0xa90   :  { %1120 = vmin.xlane.f32.xlu0 %v1119_v49  ;;  %v1124_v52 = vshll.u32 %v1123_v50, 16 }
 0xb1d   :  { %v1121_v51 = vpop.xlane.xlu0 %1120 }
 0xb1e   :  { %v1122_v54 = vcvt.f32.s32 %v1121_v51 }
 0xb20   :  { %v4803_v55 = vadd.s32 %v1124_v52, %v1122_v54 }
 0xb22   :  { %vm1126_vm3 = vcmp.eq.s32.totalorder %v4632_v27, %v4803_v55  ;;  %vm1284_vm5 = vcmp.eq.s32.totalorder %v4803_v55, 0 }
 0xb23   :  { %v3594_v56 = vsel %vm1126_vm3, 1.0, %v4526_v3  ;;  %vm1285_vm7 = vmand %vm4828_vm6, %vm1284_vm5 }
 0xb24   :  { %3948 = vmatmul.mubr.msk.f32.vlgmr.msra.gmra.mrb[8].mxu1 %vm43_vm1, %v3594_v56  ;;  %3966 = vmatmul.mubr.msk.f32.vlgmr.msra.gmra.mrb[10].mxu0 %vm43_vm1, %v3594_v56  ;;  %vm1289_vm13 = vmxor %vm1284_vm5, %vm4527_vm11 }
 0xb25   :  { %4279 = vmatpush3.bf16.msra.mxu1 %v4607_v17  ;;  %4285 = vmatpush3.bf16.msra.mxu0 %v4649_v36  ;;  %vm4896_vm15 = vmand %vm4828_vm6, %vm1289_vm13 }
 0xb26   :  { %4280 = vmatprep.subr.bf16.mxu1 %v4524_v0  ;;  %4286 = vmatprep.subr.bf16.mxu0 %v4524_v0 }
 0xb27   :  { %3976 = vmatprep.mubr.msk.f32.mxu1 %vm4525_vm0, %v4526_v3  ;;  %3987 = vmatprep.mubr.msk.f32.mxu0 %vm4525_vm0, %v4526_v3 }
 0xb29   :  { %4282 = vmatpush3.bf16.msra.mxu1 %v4613_v19  ;;  %4288 = vmatpush3.bf16.msra.mxu0 %v4663_v41 }
 0xb2a   :  { %4292 = vmatprep.subr.bf16.mxu1 %v4524_v0  ;;  %4289 = vmatprep.subr.bf16.mxu0 %v4524_v0 }
 0xbf7   :  { %v1279_v57 = vpop.f32.mrb[8].mxu1  ;;  %v1428_v58 = vpop.f32.mrb[10].mxu0 }
 0xbf8   :  { %4448 = vtanh.f32 %v1279_v57  ;;  %v3949_v59 = vpop.f32.mrb[9].mxu1  ;;  %v3967_v60 = vpop.f32.mrb[11].mxu0 }
 0xbf9   :  { %4450 = vtanh.f32 %v1428_v58 }
 0xc02   :  { %v4449_v1 = vpop.eup %4448 }
 0xc03   :  { %v4451_v4 = vpop.eup %4450  ;;  %3988 = vmatmul.mubr.msk.f32.vlgmr.msra.gmra.mrb[12].mxu0 %vm117_vm2, %v4449_v1  ;;  %v4842_v5 = vsel %vm1285_vm7, %v4449_v1, %v872_v33 }
 0xc04   :  { %3977 = vmatmul.mubr.msk.f32.vlgmr.msra.gmra.mrb[10].mxu1 %vm117_vm2, %v4451_v4  ;;  %4291 = vmatpush3.bf16.msra.mxu0 %v4679_v48 }
 0xc05   :  { %4294 = vmatpush3.bf16.msra.mxu1 %v4577_v8  ;;  %4005 = vmatprep.mubr.msk.f32.mxu1 %vm4525_vm0, %v4526_v3 }
 0xc06   :  { %4295 = vmatprep.subr.bf16.mxu1 %v4524_v0  ;;  %3994 = vmatprep.mubr.msk.f32.mxu0 %vm4525_vm0, %v4526_v3 }
 0xc07   :  { %4301 = vmatprep.subr.bf16.mxu0 %v4524_v0 }
 0xc09   :  { %4297 = vmatpush3.bf16.msra.mxu1 %v4586_v11 }
 0xc0a   :  { %4298 = vmatprep.subr.bf16.mxu1 %v4524_v0 }
 0xc0c   :  { %4006 = vmatmul.mubr.msk.f32.vlgmr.msra.gmra.mrb[12].mxu1 %vm117_vm2, %v4451_v4 }
 0xc0d   :  { %4300 = vmatpush3.bf16.msra.mxu1 %v4660_v40  ;;  %4012 = vmatprep.mubr.msk.f32.mxu1 %vm4525_vm0, %v4526_v3 }
 0xc0e   :  { %4307 = vmatprep.subr.bf16.mxu1 %v4524_v0 }
 0xcd7   :  { %v4860_v61 = vpop.f32.mrb[10].mxu1 }
 0xcd8   :  { %v3978_v6 = vpop.f32.mrb[11].mxu1  ;;  %v1506_v7 = vsel %vm43_vm1, %v4860_v61, -inf }
 0xcd9   :  { %1507 = vmax.xlane.f32.xlu1 %v1506_v7 }
 0xd66   :  { %v4864_v9 = vpop.xlane.xlu1 %1507 }
 0xd67   :  { %vm1525_vm8 = vcmp.eq.f32.partialorder %v4860_v61, %v4864_v9 }
 0xd68   :  { %v1526_v10 = vsel %vm1525_vm8, %v4632_v27, 16 }
 0xd69   :  { %v1527_v12 = vsel %vm43_vm1, %v1526_v10, 2147483647 }
 0xd6a   :  { %v1529_v13 = vshra.s32 %v1527_v12, 16  ;;  %v1528_v16 = vand.u32 65535, %v1527_v12 }
 0xd6c   :  { %v1531_v14 = vcvt.s32.f32 %v1529_v13  ;;  %v1530_v21 = vcvt.s32.f32 %v1528_v16 }
 0xd6e   :  { %1532 = vmin.xlane.f32.xlu0 %v1531_v14 }
 0xdfb   :  { %v1533_v18 = vpop.xlane.xlu0 %1532 }
 0xdfc   :  { %vm1534_vm9 = vcmp.eq.f32.partialorder %v1531_v14, %v1533_v18  ;;  %v1539_v24 = vcvt.f32.s32 %v1533_v18 }
 0xdfd   :  { %v1535_v22 = vsel %vm1534_vm9, %v1530_v21, inf }
 0xdfe   :  { %1536 = vmin.xlane.f32.xlu1 %v1535_v22  ;;  %v1540_v26 = vshll.u32 %v1539_v24, 16 }
 0xe8b   :  { %v1537_v25 = vpop.xlane.xlu1 %1536 }
 0xe8c   :  { %v1538_v30 = vcvt.f32.s32 %v1537_v25 }
 0xe8e   :  { %v4871_v31 = vadd.s32 %v1540_v26, %v1538_v30 }
 0xe90   :  { %vm1542_vm10 = vcmp.eq.s32.totalorder %v4632_v27, %v4871_v31  ;;  %vm1700_vm14 = vcmp.eq.s32.totalorder %v4871_v31, 0 }
 0xe91   :  { %v3601_v32 = vsel %vm1542_vm10, 1.0, %v4526_v3  ;;  %vm1701_vm3 = vmand %vm4896_vm15, %vm1700_vm14 }
 0xe92   :  { %3995 = vmatmul.mubr.msk.f32.vlgmr.msra.gmra.mrb[12].mxu0 %vm43_vm1, %v3601_v32  ;;  %4013 = vmatmul.mubr.msk.f32.vlgmr.msra.gmra.mrb[12].mxu1 %vm43_vm1, %v3601_v32  ;;  %v1702_v43 = vsel %vm1701_vm3, 1, %v4528_v15  ;;  %vm1705_vm9 = vmxor %vm1700_vm14, %vm4527_vm11 }
 0xe93   :  { %4303 = vmatpush3.bf16.msra.mxu0 %v4607_v17  ;;  %4309 = vmatpush3.bf16.msra.mxu1 %v4649_v36  ;;  %vm1703_vm4 = vcmp.eq.s32.totalorder %v1702_v43, 1  ;;  %vm4960_vm13 = vmand %vm4896_vm15, %vm1705_vm9 }
 0xe94   :  { %4304 = vmatprep.subr.bf16.mxu0 %v4524_v0  ;;  %4310 = vmatprep.subr.bf16.mxu1 %v4524_v0 }
 0xe95   :  { %4023 = vmatprep.mubr.msk.f32.mxu0 %vm4525_vm0, %v4526_v3  ;;  %4034 = vmatprep.mubr.msk.f32.mxu1 %vm4525_vm0, %v4526_v3 }
 0xe97   :  { %4306 = vmatpush3.bf16.msra.mxu0 %v4613_v19  ;;  %4312 = vmatpush3.bf16.msra.mxu1 %v4663_v41 }
 0xe98   :  { %4316 = vmatprep.subr.bf16.mxu0 %v4524_v0  ;;  %4313 = vmatprep.subr.bf16.mxu1 %v4524_v0 }
 0xf65   :  { %v1695_v33 = vpop.f32.mrb[12].mxu0  ;;  %v1844_v35 = vpop.f32.mrb[12].mxu1 }
 0xf66   :  { %4452 = vtanh.f32 %v1695_v33  ;;  %v3996_v37 = vpop.f32.mrb[13].mxu0  ;;  %v4014_v39 = vpop.f32.mrb[13].mxu1 }
 0xf67   :  { %4454 = vtanh.f32 %v1844_v35 }
 0xf70   :  { %v4453_v44 = vpop.eup %4452 }
 0xf71   :  { %v4455_v45 = vpop.eup %4454  ;;  %4035 = vmatmul.mubr.msk.f32.vlgmr.msra.gmra.mrb[14].mxu1 %vm117_vm2, %v4453_v44  ;;  %v4907_v46 = vsel %vm1703_vm4, %v4453_v44, %v4842_v5 }
 0xf72   :  { %4024 = vmatmul.mubr.msk.f32.vlgmr.msra.gmra.mrb[14].mxu0 %vm117_vm2, %v4455_v45  ;;  %4315 = vmatpush3.bf16.msra.mxu1 %v4679_v48 }
 0xf73   :  { %4318 = vmatpush3.bf16.msra.mxu0 %v4577_v8  ;;  %4052 = vmatprep.mubr.msk.f32.mxu0 %vm4525_vm0, %v4526_v3 }
 0xf74   :  { %4319 = vmatprep.subr.bf16.mxu0 %v4524_v0  ;;  %4041 = vmatprep.mubr.msk.f32.mxu1 %vm4525_vm0, %v4526_v3 }
 0xf75   :  { %4325 = vmatprep.subr.bf16.mxu1 %v4524_v0 }
 0xf77   :  { %4321 = vmatpush3.bf16.msra.mxu0 %v4586_v11 }
 0xf78   :  { %4322 = vmatprep.subr.bf16.mxu0 %v4524_v0 }
 0xf7a   :  { %4053 = vmatmul.mubr.msk.f32.vlgmr.msra.gmra.mrb[16].mxu0 %vm117_vm2, %v4455_v45 }
 0xf7b   :  { %4324 = vmatpush3.bf16.msra.mxu0 %v4660_v40  ;;  %4059 = vmatprep.mubr.msk.f32.mxu0 %vm4525_vm0, %v4526_v3 }
 0xf7c   :  { %4331 = vmatprep.subr.bf16.mxu0 %v4524_v0 }
0x1045   :  { %v4925_v47 = vpop.f32.mrb[14].mxu0 }
0x1046   :  { %v4025_v49 = vpop.f32.mrb[15].mxu0  ;;  %v1922_v50 = vsel %vm43_vm1, %v4925_v47, -inf }
0x1047   :  { %1923 = vmax.xlane.f32.xlu0 %v1922_v50 }
0x10d4   :  { %v4929_v51 = vpop.xlane.xlu0 %1923 }
0x10d5   :  { %vm1941_vm5 = vcmp.eq.f32.partialorder %v4925_v47, %v4929_v51 }
0x10d6   :  { %v1942_v52 = vsel %vm1941_vm5, %v4632_v27, 16 }
0x10d7   :  { %v1943_v54 = vsel %vm43_vm1, %v1942_v52, 2147483647 }
0x10d8   :  { %v1945_v56 = vshra.s32 %v1943_v54, 16  ;;  %v1944_v58 = vand.u32 65535, %v1943_v54 }
0x10da   :  { %v1947_v57 = vcvt.s32.f32 %v1945_v56  ;;  %v1946_v60 = vcvt.s32.f32 %v1944_v58 }
0x10dc   :  { %1948 = vmin.xlane.f32.xlu1 %v1947_v57 }
0x1169   :  { %v1949_v59 = vpop.xlane.xlu1 %1948 }
0x116a   :  { %vm1950_vm7 = vcmp.eq.f32.partialorder %v1947_v57, %v1949_v59  ;;  %v1955_v4 = vcvt.f32.s32 %v1949_v59 }
0x116b   :  { %v1951_v1 = vsel %vm1950_vm7, %v1946_v60, inf }
0x116c   :  { %1952 = vmin.xlane.f32.xlu0 %v1951_v1  ;;  %v1956_v6 = vshll.u32 %v1955_v4, 16 }
0x11f9   :  { %v1953_v5 = vpop.xlane.xlu0 %1952 }
0x11fa   :  { %v1954_v7 = vcvt.f32.s32 %v1953_v5 }
0x11fc   :  { %v4935_v10 = vadd.s32 %v1956_v6, %v1954_v7 }
0x11fe   :  { %vm1958_vm8 = vcmp.eq.s32.totalorder %v4632_v27, %v4935_v10  ;;  %vm2116_vm10 = vcmp.eq.s32.totalorder %v4935_v10, 0 }
0x11ff   :  { %v3608_v12 = vsel %vm1958_vm8, 1.0, %v4526_v3  ;;  %vm2117_vm3 = vmand %vm4960_vm13, %vm2116_vm10 }
0x1200   :  { %4042 = vmatmul.mubr.msk.f32.vlgmr.msra.gmra.mrb[14].mxu1 %vm43_vm1, %v3608_v12  ;;  %4060 = vmatmul.mubr.msk.f32.vlgmr.msra.gmra.mrb[16].mxu0 %vm43_vm1, %v3608_v12  ;;  %v2118_v22 = vsel %vm2117_vm3, 1, %v4528_v15  ;;  %vm2121_vm8 = vmxor %vm2116_vm10, %vm4527_vm11 }
0x1201   :  { %4327 = vmatpush3.bf16.msra.mxu1 %v4607_v17  ;;  %4333 = vmatpush3.bf16.msra.mxu0 %v4649_v36  ;;  %vm2119_vm14 = vcmp.eq.s32.totalorder %v2118_v22, 1  ;;  %vm5024_vm3 = vmand %vm4960_vm13, %vm2121_vm8 }
0x1202   :  { %4328 = vmatprep.subr.bf16.mxu1 %v4524_v0  ;;  %4334 = vmatprep.subr.bf16.mxu0 %v4524_v0  ;;  %v5288_v21 = vsel %vm5024_vm3, 1.0, %v4526_v3 }
0x1203   :  { %4070 = vmatprep.mubr.msk.f32.mxu1 %vm4525_vm0, %v4526_v3  ;;  %4081 = vmatprep.mubr.msk.f32.mxu0 %vm4525_vm0, %v4526_v3 }
0x1205   :  { %4330 = vmatpush3.bf16.msra.mxu1 %v4613_v19  ;;  %4336 = vmatpush3.bf16.msra.mxu0 %v4663_v41 }
0x1206   :  { %4340 = vmatprep.subr.bf16.mxu1 %v4524_v0  ;;  %4337 = vmatprep.subr.bf16.mxu0 %v4524_v0 }
0x12d3   :  { %v2111_v13 = vpop.f32.mrb[14].mxu1  ;;  %v2260_v14 = vpop.f32.mrb[16].mxu0 }
0x12d4   :  { %4456 = vtanh.f32 %v2111_v13  ;;  %v4043_v16 = vpop.f32.mrb[15].mxu1  ;;  %v4061_v18 = vpop.f32.mrb[17].mxu0 }
0x12d5   :  { %4458 = vtanh.f32 %v2260_v14 }
0x12de   :  { %v4457_v24 = vpop.eup %4456 }
0x12df   :  { %v4459_v25 = vpop.eup %4458  ;;  %4082 = vmatmul.mubr.msk.f32.vlgmr.msra.gmra.mrb[18].mxu0 %vm117_vm2, %v4457_v24  ;;  %v4971_v26 = vsel %vm2119_vm14, %v4457_v24, %v4907_v46 }
0x12e0   :  { %4071 = vmatmul.mubr.msk.f32.vlgmr.msra.gmra.mrb[16].mxu1 %vm117_vm2, %v4459_v25  ;;  %4339 = vmatpush3.bf16.msra.mxu0 %v4679_v48 }
0x12e1   :  { %4342 = vmatpush3.bf16.msra.mxu1 %v4577_v8  ;;  %4099 = vmatprep.mubr.msk.f32.mxu1 %vm4525_vm0, %v4526_v3 }
0x12e2   :  { %4343 = vmatprep.subr.bf16.mxu1 %v4524_v0  ;;  %4088 = vmatprep.mubr.msk.f32.mxu0 %vm4525_vm0, %v4526_v3 }
0x12e3   :  { %4349 = vmatprep.subr.bf16.mxu0 %v4524_v0 }
0x12e5   :  { %4345 = vmatpush3.bf16.msra.mxu1 %v4586_v11 }
0x12e6   :  { %4346 = vmatprep.subr.bf16.mxu1 %v4524_v0 }
0x12e8   :  { %4100 = vmatmul.mubr.msk.f32.vlgmr.msra.gmra.mrb[18].mxu1 %vm117_vm2, %v4459_v25 }
0x12e9   :  { %4348 = vmatpush3.bf16.msra.mxu1 %v4660_v40  ;;  %4106 = vmatprep.mubr.msk.f32.mxu1 %vm4525_vm0, %v4526_v3 }
0x12ea   :  { %4355 = vmatprep.subr.bf16.mxu1 %v4524_v0 }
0x13b3   :  { %v4989_v30 = vpop.f32.mrb[16].mxu1 }
0x13b4   :  { %v4072_v32 = vpop.f32.mrb[17].mxu1  ;;  %v2338_v33 = vsel %vm43_vm1, %v4989_v30, -inf }
0x13b5   :  { %2339 = vmax.xlane.f32.xlu1 %v2338_v33 }
0x1442   :  { %v4993_v35 = vpop.xlane.xlu1 %2339 }
0x1443   :  { %vm2357_vm4 = vcmp.eq.f32.partialorder %v4989_v30, %v4993_v35 }
0x1444   :  { %v2358_v37 = vsel %vm2357_vm4, %v4632_v27, 16 }
0x1445   :  { %v2359_v39 = vsel %vm43_vm1, %v2358_v37, 2147483647 }
0x1446   :  { %v2361_v43 = vshra.s32 %v2359_v39, 16  ;;  %v2360_v45 = vand.u32 65535, %v2359_v39 }
0x1448   :  { %v2363_v44 = vcvt.s32.f32 %v2361_v43  ;;  %v2362_v49 = vcvt.s32.f32 %v2360_v45 }
0x144a   :  { %2364 = vmin.xlane.f32.xlu0 %v2363_v44 }
0x14d7   :  { %v2365_v46 = vpop.xlane.xlu0 %2364 }
0x14d8   :  { %vm2366_vm5 = vcmp.eq.f32.partialorder %v2363_v44, %v2365_v46  ;;  %v2371_v52 = vcvt.f32.s32 %v2365_v46 }
0x14d9   :  { %v2367_v50 = vsel %vm2366_vm5, %v2362_v49, inf }
0x14da   :  { %2368 = vmin.xlane.f32.xlu1 %v2367_v50  ;;  %v2372_v56 = vshll.u32 %v2371_v52, 16 }
0x1567   :  { %v2369_v54 = vpop.xlane.xlu1 %2368 }
0x1568   :  { %v2370_v57 = vcvt.f32.s32 %v2369_v54 }
0x156a   :  { %v4999_v58 = vadd.s32 %v2372_v56, %v2370_v57 }
0x156c   :  { %vm2374_vm7 = vcmp.eq.s32.totalorder %v4632_v27, %v4999_v58  ;;  %vm2532_vm9 = vcmp.eq.s32.totalorder %v4999_v58, 0 }
0x156d   :  { %v3615_v59 = vsel %vm2374_vm7, 1.0, %v4526_v3  ;;  %vm2533_vm14 = vmand %vm5024_vm3, %vm2532_vm9 }
0x156e   :  { %4089 = vmatmul.mubr.msk.f32.vlgmr.msra.gmra.mrb[18].mxu0 %vm43_vm1, %v3615_v59  ;;  %4107 = vmatmul.mubr.msk.f32.vlgmr.msra.gmra.mrb[18].mxu1 %vm43_vm1, %v3615_v59  ;;  %v2534_v7 = vsel %vm2533_vm14, 1, %v4528_v15  ;;  %vm2537_vm8 = vmxor %vm2532_vm9, %vm4527_vm11 }
0x156f   :  { %4351 = vmatpush3.bf16.msra.mxu0 %v4607_v17  ;;  %4357 = vmatpush3.bf16.msra.mxu1 %v4649_v36  ;;  %vm2535_vm10 = vcmp.eq.s32.totalorder %v2534_v7, 1 }
0x1570   :  { %4352 = vmatprep.subr.bf16.mxu0 %v4524_v0  ;;  %4358 = vmatprep.subr.bf16.mxu1 %v4524_v0 }
0x1571   :  { %4117 = vmatprep.mubr.msk.f32.mxu0 %vm4525_vm0, %v4526_v3  ;;  %4128 = vmatprep.mubr.msk.f32.mxu1 %vm4525_vm0, %v4526_v3 }
0x1573   :  { %4354 = vmatpush3.bf16.msra.mxu0 %v4613_v19  ;;  %4360 = vmatpush3.bf16.msra.mxu1 %v4663_v41 }
0x1574   :  { %4364 = vmatprep.subr.bf16.mxu0 %v4524_v0  ;;  %4361 = vmatprep.subr.bf16.mxu1 %v4524_v0 }
0x1641   :  { %v2527_v60 = vpop.f32.mrb[18].mxu0  ;;  %v2676_v1 = vpop.f32.mrb[18].mxu1 }
0x1642   :  { %4460 = vtanh.f32 %v2527_v60  ;;  %v4090_v4 = vpop.f32.mrb[19].mxu0  ;;  %v4108_v5 = vpop.f32.mrb[19].mxu1 }
0x1643   :  { %4462 = vtanh.f32 %v2676_v1 }
0x164c   :  { %v4461_v12 = vpop.eup %4460 }
0x164d   :  { %v4463_v13 = vpop.eup %4462  ;;  %4129 = vmatmul.mubr.msk.f32.vlgmr.msra.gmra.mrb[20].mxu1 %vm117_vm2, %v4461_v12  ;;  %v5035_v14 = vsel %vm2535_vm10, %v4461_v12, %v4971_v26  ;;  %vm5088_vm10 = vmand %vm5024_vm3, %vm2537_vm8  ;;  %vm3534_vm3 = vcmask 39936  }
0x164e   :  { %4118 = vmatmul.mubr.msk.f32.vlgmr.msra.gmra.mrb[20].mxu0 %vm117_vm2, %v4463_v13  ;;  %4363 = vmatpush3.bf16.msra.mxu1 %v4679_v48 }
0x164f   :  { %4366 = vmatpush3.bf16.msra.mxu0 %v4577_v8  ;;  %4146 = vmatprep.mubr.msk.f32.mxu0 %vm4525_vm0, %v4526_v3 }
0x1650   :  { %4367 = vmatprep.subr.bf16.mxu0 %v4524_v0  ;;  %4135 = vmatprep.mubr.msk.f32.mxu1 %vm4525_vm0, %v4526_v3 }
0x1651   :  { %4373 = vmatprep.subr.bf16.mxu1 %v4524_v0 }
0x1653   :  { %4369 = vmatpush3.bf16.msra.mxu0 %v4586_v11 }
0x1654   :  { %4370 = vmatprep.subr.bf16.mxu0 %v4524_v0 }
0x1656   :  { %4147 = vmatmul.mubr.msk.f32.vlgmr.msra.gmra.mrb[22].mxu0 %vm117_vm2, %v4463_v13  ;;  %v5119_v13 = vsub.f32 %v4724_v62, %v4728_v2 }
0x1657   :  { %4372 = vmatpush3.bf16.msra.mxu0 %v4660_v40  ;;  %4153 = vmatprep.mubr.msk.f32.mxu0 %vm4525_vm0, %v4526_v3 }
0x1658   :  { %4379 = vmatprep.subr.bf16.mxu0 %v4524_v0 }
0x1721   :  { %v5053_v8 = vpop.f32.mrb[20].mxu0 }
0x1722   :  { %v4119_v16 = vpop.f32.mrb[21].mxu0  ;;  %v2754_v18 = vsel %vm43_vm1, %v5053_v8, -inf }
0x1723   :  { %2755 = vmax.xlane.f32.xlu0 %v2754_v18  ;;  %v5124_v16 = vsub.f32 %v4793_v34, %v4797_v38 }
0x1725   :  { %v1094_v18 = vmul.f32 1.442695, %v5124_v16 }
0x17b0   :  { %v5057_v22 = vpop.xlane.xlu0 %2755 }
0x17b1   :  { %vm2773_vm4 = vcmp.eq.f32.partialorder %v5053_v8, %v5057_v22  ;;  %v5134_v62 = vsub.f32 %v5053_v8, %v5057_v22 }
0x17b2   :  { %v2774_v11 = vsel %vm2773_vm4, %v4632_v27, 16 }
0x17b3   :  { %v2775_v40 = vsel %vm43_vm1, %v2774_v11, 2147483647  ;;  %v5129_v11 = vsub.f32 %v4925_v47, %v4929_v51  ;;  %v2758_v34 = vmul.f32 1.442695, %v5134_v62 }
0x17b4   :  { %v2777_v24 = vshra.s32 %v2775_v40, 16  ;;  %v2776_v26 = vand.u32 65535, %v2775_v40 }
0x17b6   :  { %v2779_v25 = vcvt.s32.f32 %v2777_v24  ;;  %v2778_v33 = vcvt.s32.f32 %v2776_v26  ;;  %v1926_v24 = vmul.f32 1.442695, %v5129_v11 }
0x17b8   :  { %2780 = vmin.xlane.f32.xlu1 %v2779_v25 }
0x1845   :  { %v2781_v32 = vpop.xlane.xlu1 %2780 }
0x1846   :  { %vm2782_vm5 = vcmp.eq.f32.partialorder %v2779_v25, %v2781_v32  ;;  %v2787_v39 = vcvt.f32.s32 %v2781_v32 }
0x1847   :  { %v2783_v37 = vsel %vm2782_vm5, %v2778_v33, inf }
0x1848   :  { %2784 = vmin.xlane.f32.xlu0 %v2783_v37  ;;  %v2788_v44 = vshll.u32 %v2787_v39, 16 }
0x18d5   :  { %v2785_v43 = vpop.xlane.xlu0 %2784 }
0x18d6   :  { %v2786_v45 = vcvt.f32.s32 %v2785_v43 }
0x18d8   :  { %v5063_v46 = vadd.s32 %v2788_v44, %v2786_v45 }
0x18da   :  { %vm2790_vm7 = vcmp.eq.s32.totalorder %v4632_v27, %v5063_v46  ;;  %vm2948_vm14 = vcmp.eq.s32.totalorder %v5063_v46, 0 }
0x18db   :  { %v3622_v49 = vsel %vm2790_vm7, 1.0, %v4526_v3  ;;  %vm2949_vm4 = vmand %vm5088_vm10, %vm2948_vm14 }
0x18dc   :  { %4136 = vmatmul.mubr.msk.f32.vlgmr.msra.gmra.mrb[20].mxu1 %vm43_vm1, %v3622_v49  ;;  %4154 = vmatmul.mubr.msk.f32.vlgmr.msra.gmra.mrb[22].mxu0 %vm43_vm1, %v3622_v49  ;;  %vm5175_vm8 = vmxor %vm2948_vm14, %vm4527_vm11  ;;  %vm3485_vm11 = vcmask 7168   ;;  %vm3536_vm14 = vcmask 48128  }
0x18dd   :  { %4375 = vmatpush3.bf16.msra.mxu1 %v4607_v17  ;;  %4381 = vmatpush3.bf16.msra.mxu0 %v4649_v36 }
0x18de   :  { %4376 = vmatprep.subr.bf16.mxu1 %v4524_v0  ;;  %4382 = vmatprep.subr.bf16.mxu0 %v4524_v0 }
0x18df   :  { %4164 = vmatprep.mubr.msk.f32.mxu1 %vm4525_vm0, %v4526_v3  ;;  %4175 = vmatprep.mubr.msk.f32.mxu0 %vm4525_vm0, %v4526_v3 }
0x18e1   :  { %4378 = vmatpush3.bf16.msra.mxu1 %v4613_v19  ;;  %4384 = vmatpush3.bf16.msra.mxu0 %v4663_v41  ;;  %v2950_v41 = vsel %vm2949_vm4, 1, %v4528_v15  ;;  %vm2954_vm4 = vmand %vm5088_vm10, %vm5175_vm8  ;;  %vm3546_vm8 = vcmask 89088  }
0x18e2   :  { %4385 = vmatprep.subr.bf16.mxu0 %v4524_v0  ;;  %4388 = vmatprep.subr.bf16.mxu1 %v4524_v0  ;;  %vm2951_vm9 = vcmp.eq.s32.totalorder %v2950_v41, 1 }
0x19af   :  { %v2943_v17 = vpop.f32.mrb[20].mxu1  ;;  %v3092_v36 = vpop.f32.mrb[22].mxu0 }
0x19b0   :  { %4464 = vtanh.f32 %v2943_v17  ;;  %v4137_v50 = vpop.f32.mrb[21].mxu1  ;;  %v4155_v52 = vpop.f32.mrb[23].mxu0 }
0x19b1   :  { %4466 = vtanh.f32 %v3092_v36  ;;  %v35_v36 = vld [vmem:[%s5389_s3 + $0x20] sm:$0xff]  ;;  %v36_v50 = vld [vmem:[%s5389_s3 + $0x28] sm:$0xff]  ;;  %v37_v52 = vld [vmem:[%s5389_s3 + $0x30] sm:$0xff] }
0x19b2   :  { %v4389_v41 = vpack.c.bf16 %v36_v50, %v35_v36 }
0x19ba   :  { %v4465_v54 = vpop.eup %4464 }
0x19bb   :  { %v4467_v56 = vpop.eup %4466  ;;  %4176 = vmatmul.mubr.msk.f32.vlgmr.msra.gmra.mrb[24].mxu0 %vm117_vm2, %v4465_v54  ;;  %v5099_v57 = vsel %vm2951_vm9, %v4465_v54, %v5035_v14  ;;  %v678_v14 = vmul.f32 1.442695, %v5119_v13  ;;  %v38_v54 = vld [vmem:[%s5389_s3 + $0x38] sm:$0xff] }
0x19bc   :  { %4165 = vmatmul.mubr.msk.f32.vlgmr.msra.gmra.mrb[22].mxu1 %vm117_vm2, %v4467_v56  ;;  %4387 = vmatpush3.bf16.msra.mxu0 %v4679_v48  ;;  %v4392_v56 = vpack.c.bf16 %v38_v54, %v37_v52 }
0x19bd   :  { %4182 = vmatprep.mubr.msk.f32.mxu0 %vm4525_vm0, %v4526_v3  ;;  %4193 = vmatprep.mubr.msk.f32.mxu1 %vm4525_vm0, %v4526_v3  ;;  %4468 = vpow2.f32 %v678_v14 }
0x19be   :  { %4470 = vpow2.f32 %v1094_v18  ;;  %4390 = vmatpush3.bf16.msra.mxu1 %v4389_v41  ;;  %v5198_v18 = vsub.f32 %v4860_v61, %v4864_v9 }
0x19bf   :  { %4472 = vpow2.f32 %v1926_v24  ;;  %4391 = vmatprep.subr.bf16.mxu1 %v4524_v0  ;;  %v3210_v0 = vsel %vm2954_vm4, 1, %v4528_v15  ;;  %v5203_v15 = vsub.f32 %v4989_v30, %v4993_v35 }
0x19c0   :  { %4474 = vpow2.f32 %v2758_v34  ;;  %vm3364_vm9 = vcmp.eq.s32.totalorder %v3210_v0, 1 }
0x19c2   :  { %4393 = vmatpush3.bf16.msra.mxu1 %v4392_v56  ;;  %v5252_v56 = vsel %vm4757_vm12, 1.0, %v4526_v3 }
0x19c7   :  { %v5137_v26 = vpop.eup %4468 }
0x19c8   :  { %v680_v47 = vsel %vm43_vm1, %v5137_v26, 0.0  ;;  %v5141_v51 = vpop.eup %4470 }
0x19c9   :  { %v1096_v8 = vsel %vm43_vm1, %v5141_v51, 0.0  ;;  %v5145_v22 = vpop.eup %4472 }
0x19ca   :  { %v1928_v32 = vsel %vm43_vm1, %v5145_v22, 0.0  ;;  %v5149_v33 = vpop.eup %4474 }
0x19cb   :  { %v2760_v37 = vsel %vm43_vm1, %v5149_v33, 0.0 }
0x1a8f   :  { %v5107_v59 = vpop.f32.mrb[22].mxu1 }
0x1a90   :  { %v4166_v60 = vpop.f32.mrb[23].mxu1  ;;  %v3170_v1 = vsel %vm43_vm1, %v5107_v59, -inf }
0x1a91   :  { %3171 = vmax.xlane.f32.xlu1 %v3170_v1 }
0x1b1e   :  { %v5111_v4 = vpop.xlane.xlu1 %3171 }
0x1b1f   :  { %vm3189_vm5 = vcmp.eq.f32.partialorder %v5107_v59, %v5111_v4 }
0x1b20   :  { %v3190_v48 = vsel %vm3189_vm5, %v4632_v27, 16  ;;  %vm3540_vm5 = vcmask 64512  }
0x1b21   :  { %v3191_v5 = vsel %vm43_vm1, %v3190_v48, 2147483647 }
0x1b22   :  { %v3193_v7 = vshra.s32 %v3191_v5, 16  ;;  %v3192_v40 = vand.u32 65535, %v3191_v5 }
0x1b24   :  { %v3195_v12 = vcvt.s32.f32 %v3193_v7  ;;  %v3194_v25 = vcvt.s32.f32 %v3192_v40  ;;  %v1510_v40 = vmul.f32 1.442695, %v5198_v18 }
0x1b26   :  { %3196 = vmin.xlane.f32.xlu0 %v3195_v12 }
0x1bb3   :  { %v3197_v2 = vpop.xlane.xlu0 %3196 }
0x1bb4   :  { %vm3198_vm0 = vcmp.eq.f32.partialorder %v3195_v12, %v3197_v2  ;;  %v3203_v39 = vcvt.f32.s32 %v3197_v2  ;;  %v5193_v12 = vsub.f32 %v4628_v23, %v4634_v28  ;;  %v5208_v23 = vsub.f32 %v5107_v59, %v5111_v4 }
0x1bb5   :  { %v3199_v38 = vsel %vm3198_vm0, %v3194_v25, inf  ;;  %vm3542_vm0 = vcmask 72704  }
0x1bb6   :  { %3200 = vmin.xlane.f32.xlu1 %v3199_v38  ;;  %v3204_v44 = vshll.u32 %v3203_v39, 16  ;;  %v269_v14 = vmul.f32 1.442695, %v5193_v12  ;;  %v3174_v28 = vmul.f32 1.442695, %v5208_v23 }
0x1bba   :  { %681 = vadd.xlane.f32.xlu1 %v680_v47  ;;  %v5234_v47 = vld [vmem:[%s5390_s1] sm:$0xff]  ;;  %s4529_s1 = smov 17  }
0x1bbe   :  { %1097 = vadd.xlane.f32.xlu1 %v1096_v8 }
0x1bc2   :  { %1929 = vadd.xlane.f32.xlu1 %v1928_v32 }
0x1bc6   :  { %2761 = vadd.xlane.f32.xlu1 %v2760_v37 }
0x1c43   :  { %v3201_v43 = vpop.xlane.xlu1 %3200 }
0x1c44   :  { %v3202_v45 = vcvt.f32.s32 %v3201_v43 }
0x1c46   :  { %v5153_v49 = vadd.s32 %v3204_v44, %v3202_v45 }
0x1c47   :  { %v682_v8 = vpop.xlane.xlu1 %681 }
0x1c48   :  { %vm3206_vm7 = vcmp.eq.s32.totalorder %v4632_v27, %v5153_v49 }
0x1c49   :  { %v3629_v17 = vsel %vm3206_vm7, 1.0, %v4526_v3  ;;  %vm3544_vm7 = vcmask 80896  }
0x1c4a   :  { %4183 = vmatmul.mubr.msk.f32.vlgmr.msra.gmra.mrb[24].mxu0 %vm43_vm1, %v3629_v17 }
0x1c4b   :  { %v1098_v32 = vpop.xlane.xlu1 %1097 }
0x1c4f   :  { %v1930_v37 = vpop.xlane.xlu1 %1929 }
0x1c53   :  { %v5246_v36 = vpop.xlane.xlu1 %2761 }
0x1d1d   :  { %v3359_v60 = vpop.f32.mrb[24].mxu0 }
0x1d1e   :  { %4476 = vtanh.f32 %v3359_v60  ;;  %v4184_v1 = vpop.f32.mrb[25].mxu0 }
0x1d1f   :  { %4478 = vpow2.f32 %v269_v14  ;;  %v720_v14 = vadd.f32 1.0, %v5252_v56 }
0x1d20   :  { %4480 = vpow2.f32 %v1510_v40 }
0x1d28   :  { %v4477_v5 = vpop.eup %4476 }
0x1d29   :  { %v3365_v7 = vsel %vm3364_vm9, %v4477_v5, %v5099_v57  ;;  %v2342_v57 = vmul.f32 1.442695, %v5203_v15  ;;  %v5215_v2 = vpop.eup %4478  ;;  %v5258_v5 = vsel %vm4828_vm6, 1.0, %v4526_v3  ;;  %vm3528_vm6 = vcmask 15360  }
0x1d2a   :  { %4194 = vmatmul.mubr.msk.f32.vlgmr.msra.gmra.mrb[24].mxu1 %vm117_vm2, %v3365_v7  ;;  %v271_v30 = vsel %vm43_vm1, %v5215_v2, 0.0  ;;  %v5219_v35 = vpop.eup %4480  ;;  %vm3550_vm9 = vcmask 105472  }
0x1d2b   :  { %4482 = vpow2.f32 %v2342_v57  ;;  %v1512_v59 = vsel %vm43_vm1, %v5219_v35, 0.0 }
0x1d2c   :  { %4484 = vpow2.f32 %v3174_v28 }
0x1d2d   :  { %4486 = vlog2.f32 %v682_v8 }
0x1d2e   :  { %4488 = vrcp.f32 %v682_v8 }
0x1d2f   :  { %4490 = vlog2.f32 %v1098_v32 }
0x1d30   :  { %4492 = vrcp.f32 %v1098_v32 }
0x1d31   :  { %4494 = vlog2.f32 %v1930_v37 }
0x1d35   :  { %v5223_v4 = vpop.eup %4482 }
0x1d36   :  { %v2344_v25 = vsel %vm43_vm1, %v5223_v4, 0.0  ;;  %v5227_v34 = vpop.eup %4484 }
0x1d37   :  { %v3176_v38 = vsel %vm43_vm1, %v5227_v34, 0.0  ;;  %v4487_v17 = vpop.eup %4486 }
0x1d38   :  { %v684_v50 = vmul.f32 0.6931472, %v4487_v17  ;;  %v4489_v41 = vpop.eup %4488 }
0x1d39   :  { %v4491_v54 = vpop.eup %4490  ;;  %v686_v29 = vmul.f32 %v4489_v41, %v5137_v26  ;;  %v5279_v41 = vsel %vm4960_vm13, 1.0, %v4526_v3  ;;  %vm3532_vm13 = vcmask 31744  }
0x1d3a   :  { %v687_v1 = vsub.f32 %v5119_v13, %v684_v50  ;;  %v4493_v0 = vpop.eup %4492  ;;  %v713_v40 = vsub.f32 0.0, %v684_v50  ;;  %v1100_v57 = vmul.f32 0.6931472, %v4491_v54 }
0x1d3b   :  { %v4495_v7 = vpop.eup %4494 }
0x1d3c   :  { %v718_v32 = vmul.f32 %v5252_v56, %v713_v40  ;;  %v1129_v42 = vsub.f32 0.0, %v1100_v57 }
0x1dfd   :  { %v5211_v24 = vpop.f32.mrb[24].mxu1 }
0x1dfe   :  { %v4195_v61 = vpop.f32.mrb[25].mxu1  ;;  %v3440_v9 = vsel %vm43_vm1, %v5211_v24, -inf }
0x1dff   :  { %3441 = vmax.xlane.f32.xlu0 %v3440_v9  ;;  %v5265_v61 = vsel %vm4896_vm15, 1.0, %v4526_v3  ;;  %v1136_v9 = vadd.f32 %v5258_v5, %v720_v14  ;;  %vm3530_vm15 = vcmask 23552  }
0x1e03   :  { %272 = vadd.xlane.f32.xlu0 %v271_v30 }
0x1e07   :  { %1513 = vadd.xlane.f32.xlu0 %v1512_v59  ;;  %v688_v59 = vmul.f32 %v687_v1, %v686_v29 }
0x1e09   :  { %v689_v1 = vsel %vm43_vm1, %v688_v59, 0.0 }
0x1e0b   :  { %2345 = vadd.xlane.f32.xlu0 %v2344_v25 }
0x1e0f   :  { %3177 = vadd.xlane.f32.xlu0 %v3176_v38  ;;  %v5269_v38 = vmul.f32 0.6931472, %v4495_v7  ;;  %v1102_v7 = vmul.f32 %v4493_v0, %v5141_v51 }
0x1e11   :  { %v1961_v14 = vsub.f32 0.0, %v5269_v38 }
0x1e13   :  { %v1966_v6 = vmul.f32 %v5279_v41, %v1961_v14 }
0x1e25   :  { %3453 = vperm.xlu0 %4437, %v5234_v47  }
0x1e8c   :  { %v5237_v39 = vpop.xlane.xlu0 %3441 }
0x1e8d   :  { %v5241_v43 = vsub.f32 %v5211_v24, %v5237_v39  ;;  %vm3463_vm2 = vcmp.eq.f32.partialorder %v5211_v24, %v5237_v39 }
0x1e8f   :  { %v3444_v44 = vmul.f32 1.442695, %v5241_v43 }
0x1e90   :  { %v273_v45 = vpop.xlane.xlu0 %272 }
0x1e91   :  { %4496 = vpow2.f32 %v3444_v44  ;;  %v1552_v44 = vadd.f32 %v5265_v61, %v1136_v9 }
0x1e92   :  { %4498 = vlog2.f32 %v273_v45 }
0x1e93   :  { %4500 = vrcp.f32 %v273_v45  ;;  %v1968_v0 = vadd.f32 %v5279_v41, %v1552_v44 }
0x1e94   :  { %4502 = vlog2.f32 %v5246_v36  ;;  %v1514_v52 = vpop.xlane.xlu0 %1513 }
0x1e95   :  { %4504 = vlog2.f32 %v1514_v52 }
0x1e96   :  { %4506 = vrcp.f32 %v1514_v52  ;;  %v1103_v52 = vsub.f32 %v5124_v16, %v1100_v57 }
0x1e98   :  { %v2346_v60 = vpop.xlane.xlu0 %2345 }
0x1e99   :  { %4508 = vlog2.f32 %v2346_v60 }
0x1e9a   :  { %4510 = vrcp.f32 %v1930_v37 }
0x1e9b   :  { %v4497_v28 = vpop.eup %4496 }
0x1e9c   :  { %v4499_v13 = vpop.eup %4498  ;;  %v3178_v63 = vpop.xlane.xlu0 %3177  ;;  %v3446_v30 = vsel %vm43_vm1, %v4497_v28, 0.0 }
0x1e9d   :  { %v4501_v25 = vpop.eup %4500  ;;  %v275_v8 = vmul.f32 0.6931472, %v4499_v13  ;;  %4512 = vlog2.f32 %v3178_v63  ;;  %3447 = vadd.xlane.f32.xlu1 %v3446_v30  ;;  %v1104_v13 = vmul.f32 %v1103_v52, %v1102_v7 }
0x1e9e   :  { %v4503_v26 = vpop.eup %4502  ;;  %v277_v37 = vmul.f32 %v4501_v25, %v5215_v2  ;;  %4514 = vrcp.f32 %v2346_v60  ;;  %v5295_v60 = vsel %vm5088_vm10, 1.0, %v4526_v3  ;;  %vm3538_vm10 = vcmask 56320  }
0x1e9f   :  { %v4505_v45 = vpop.eup %4504  ;;  %v304_v17 = vsub.f32 0.0, %v275_v8  ;;  %v278_v50 = vsub.f32 %v5193_v12, %v275_v8  ;;  %v1134_v12 = vmul.f32 %v5258_v5, %v1129_v42  ;;  %v2764_v16 = vmul.f32 0.6931472, %v4503_v26 }
0x1ea0   :  { %v1516_v54 = vmul.f32 0.6931472, %v4505_v45  ;;  %v4507_v29 = vpop.eup %4506  ;;  %4516 = vrcp.f32 %v5246_v36  ;;  %v5313_v36 = vsel %vm2954_vm4, 1.0, %v4526_v3  ;;  %vm3548_vm4 = vcmask 97280  }
0x1ea1   :  { %v719_v40 = vadd.f32 %v718_v32, %v304_v17  ;;  %690 = vadd.xlane.f32.xlu1 %v689_v1  ;;  %v279_v2 = vmul.f32 %v278_v50, %v277_v37  ;;  %v2793_v26 = vsub.f32 0.0, %v2764_v16  ;;  %v1518_v44 = vmul.f32 %v4507_v29, %v5219_v35 }
0x1ea2   :  { %v1545_v57 = vsub.f32 0.0, %v1516_v54  ;;  %v1519_v51 = vsub.f32 %v5198_v18, %v1516_v54  ;;  %v2384_v18 = vadd.f32 %v5288_v21, %v1968_v0  ;;  %v1105_v17 = vsel %vm43_vm1, %v1104_v13, 0.0 }
0x1ea3   :  { %v4509_v28 = vpop.eup %4508  ;;  %v1135_v9 = vadd.f32 %v1134_v12, %v719_v40  ;;  %v280_v25 = vsel %vm43_vm1, %v279_v2, 0.0  ;;  %v1935_v37 = vsub.f32 %v5129_v11, %v5269_v38  ;;  %4518 = vrcp.f32 %v3178_v63 }
0x1ea4   :  { %v1550_v30 = vmul.f32 %v5265_v61, %v1545_v57  ;;  %v2348_v59 = vmul.f32 0.6931472, %v4509_v28  ;;  %v4511_v8 = vpop.eup %4510  ;;  %v2800_v50 = vadd.f32 %v5295_v60, %v2384_v18  ;;  %v1520_v35 = vmul.f32 %v1519_v51, %v1518_v44 }
0x1ea5   :  { %281 = vadd.xlane.f32.xlu1 %v280_v25  ;;  %v1934_v7 = vmul.f32 %v4511_v8, %v5145_v22  ;;  %v2798_v14 = vmul.f32 %v5295_v60, %v2793_v26 }
0x1ea6   :  { %v1551_v32 = vadd.f32 %v1550_v30, %v1135_v9  ;;  %v2377_v42 = vsub.f32 0.0, %v2348_v59  ;;  %v5319_v19 = vadd.f32 %v5313_v36, %v2800_v50  ;;  %v1521_v2 = vsel %vm43_vm1, %v1520_v35, 0.0 }
0x1ea7   :  { %v4513_v45 = vpop.eup %4512  ;;  %v1936_v40 = vmul.f32 %v1935_v37, %v1934_v7  ;;  %v2351_v57 = vsub.f32 %v5203_v15, %v2348_v59  ;;  %v2767_v30 = vsub.f32 %v5134_v62, %v2764_v16 }
0x1ea8   :  { %v2382_v52 = vmul.f32 %v5288_v21, %v2377_v42  ;;  %v3180_v54 = vmul.f32 0.6931472, %v4513_v45  ;;  %v1967_v1 = vadd.f32 %v1966_v6, %v1551_v32  ;;  %v4515_v48 = vpop.eup %4514  ;;  %v3498_v22 = vmul.f32 0.02, %v5319_v19  ;;  %v3454_v42 = vpop.permute.xlu0 %3453 }
0x1ea9   :  { %1106 = vadd.xlane.f32.xlu1 %v1105_v17  ;;  %v2350_v28 = vmul.f32 %v4515_v48, %v5223_v4  ;;  %v1937_v51 = vsel %vm43_vm1, %v1936_v40, 0.0  ;;  %vm3455_vm12 = vcmp.eq.s32.totalorder %v4632_v27, %v3454_v42 }
0x1eaa   :  { %v3209_v11 = vsub.f32 0.0, %v3180_v54  ;;  %v2383_v38 = vadd.f32 %v2382_v52, %v1967_v1  ;;  %v4517_v13 = vpop.eup %4516  ;;  %v3183_v4 = vsub.f32 %v5208_v23, %v3180_v54  ;;  %v3634_v35 = vsel %vm3455_vm12, 1.0, %v4526_v3 }
0x1eab   :  { %v2352_v9 = vmul.f32 %v2351_v57, %v2350_v28  ;;  %v2766_v15 = vmul.f32 %v4517_v13, %v5149_v33  ;;  %vm3554_vm12 = vcmask 121856  }
0x1eac   :  { %v2799_v29 = vadd.f32 %v2798_v14, %v2383_v38  ;;  %v3214_v12 = vmul.f32 %v5313_v36, %v3209_v11 }
0x1ead   :  { %1522 = vadd.xlane.f32.xlu1 %v1521_v2  ;;  %v4519_v59 = vpop.eup %4518  ;;  %v2353_v6 = vsel %vm43_vm1, %v2352_v9, 0.0  ;;  %v2768_v18 = vmul.f32 %v2767_v30, %v2766_v15 }
0x1eae   :  { %v5324_v63 = vadd.f32 %v3214_v12, %v2799_v29  ;;  %v3182_v8 = vmul.f32 %v4519_v59, %v5227_v34  ;;  %v3464_v34 = vsel %vm3463_vm2, %v4632_v27, 16  ;;  %vm3552_vm2 = vcmask 113664  }
0x1eaf   :  { %v2769_v26 = vsel %vm43_vm1, %v2768_v18, 0.0  ;;  %v5347_v7 = vsel %vm43_vm1, %v3464_v34, 2147483647 }
0x1eb0   :  { %v3499_v0 = vmul.f32 %v3498_v22, %v5324_v63  ;;  %v3184_v32 = vmul.f32 %v3183_v4, %v3182_v8  ;;  %v3467_v27 = vshra.s32 %v5347_v7, 16 }
0x1eb1   :  { %1938 = vadd.xlane.f32.xlu1 %v1937_v51 }
0x1eb2   :  { %v3500_v25 = vsel %vm3485_vm11, %v3499_v0, 0.0  ;;  %v3185_v62 = vsel %vm43_vm1, %v3184_v32, 0.0  ;;  %v5351_v12 = vcvt.s32.f32 %v3467_v27  ;;  %v875_v32 = vcvt.s32.f32 %v4734_v20 }
0x1eb3   :  { %3501 = vadd.xlane.f32.xlu0 %v3500_v25  ;;  %v2539_v20 = vcvt.s32.f32 %v4999_v58 }
0x1eb5   :  { %2354 = vadd.xlane.f32.xlu1 %v2353_v6 }
0x1eb9   :  { %2770 = vadd.xlane.f32.xlu1 %v2769_v26 }
0x1ebd   :  { %3186 = vadd.xlane.f32.xlu1 %v3185_v62 }
0x1f2a   :  { %v3448_v16 = vpop.xlane.xlu1 %3447 }
0x1f2b   :  { %4520 = vlog2.f32 %v3448_v16 }
0x1f2c   :  { %4522 = vrcp.f32 %v5319_v19 }
0x1f2e   :  { %v691_v33 = vpop.xlane.xlu1 %690 }
0x1f2f   :  { %v692_v45 = vsub.f32 0.0, %v691_v33  ;;  %v1291_v33 = vcvt.s32.f32 %v4803_v55 }
0x1f32   :  { %v282_v44 = vpop.xlane.xlu1 %281 }
0x1f33   :  { %v283_v17 = vsub.f32 0.0, %v282_v44 }
0x1f35   :  { %v4521_v23 = vpop.eup %4520  ;;  %v3527_v37 = vsel %vm3485_vm11, %v283_v17, %v692_v45 }
0x1f36   :  { %v3450_v50 = vmul.f32 0.6931472, %v4521_v23  ;;  %v1107_v52 = vpop.xlane.xlu1 %1106 }
0x1f37   :  { %v1108_v54 = vsub.f32 0.0, %v1107_v52 }
0x1f38   :  { %v3451_v1 = vsub.f32 %v5241_v43, %v3450_v50  ;;  %v716_v43 = vmul.f32 %v5252_v56, %v692_v45  ;;  %v3366_v50 = vcvt.s32.f32 %v5153_v49 }
0x1f39   :  { %v3529_v11 = vsel %vm3528_vm6, %v3527_v37, %v1108_v54  ;;  %v1132_v57 = vmul.f32 %v5258_v5, %v1108_v54 }
0x1f3a   :  { %v1523_v38 = vpop.xlane.xlu1 %1522  ;;  %v3458_v14 = vmul.f32 %v3634_v35, %v3451_v1  ;;  %v717_v13 = vadd.f32 %v716_v43, %v283_v17  ;;  %v4523_v17 = vpop.eup %4522 }
0x1f3b   :  { %v1524_v48 = vsub.f32 0.0, %v1523_v38 }
0x1f3c   :  { %v3459_v39 = vsel %vm43_vm1, %v3458_v14, 0.0  ;;  %v1133_v9 = vadd.f32 %v1132_v57, %v717_v13 }
0x1f3d   :  { %v3531_v40 = vsel %vm3530_vm15, %v3529_v11, %v1524_v48  ;;  %3460 = vadd.xlane.f32.xlu1 %v3459_v39  ;;  %v1548_v51 = vmul.f32 %v5265_v61, %v1524_v48  ;;  %v3466_v11 = vand.u32 65535, %v5347_v7  ;;  %vm3561_vm15 = vcmask 138240  }
0x1f3e   :  { %v1939_v2 = vpop.xlane.xlu1 %1938 }
0x1f3f   :  { %v1940_v29 = vsub.f32 0.0, %v1939_v2  ;;  %v1549_v56 = vadd.f32 %v1548_v51, %v1133_v9  ;;  %v3468_v49 = vcvt.s32.f32 %v3466_v11 }
0x1f40   :  { %v3502_v27 = vpop.xlane.xlu0 %3501 }
0x1f41   :  { %v3533_v22 = vsel %vm3532_vm13, %v3531_v40, %v1940_v29  ;;  %3470 = vmin.xlane.f32.xlu1 %v5351_v12  ;;  %v1964_v30 = vmul.f32 %v5279_v41, %v1940_v29  ;;  %v459_v41 = vcvt.s32.f32 %v4683_v53  ;;  %v2123_v53 = vcvt.s32.f32 %v4935_v10 }
0x1f42   :  { %v2355_v28 = vpop.xlane.xlu1 %2354  ;;  %v3503_v39 = vrot.slane %v3502_v27, 4  ;;  %vm3563_vm13 = vcmask 146432  }
0x1f43   :  { %v2356_v0 = vsub.f32 0.0, %v2355_v28  ;;  %v1965_v6 = vadd.f32 %v1964_v30, %v1549_v56 }
0x1f44   :  { %v3504_v40 = vadd.f32 %v3503_v39, %v3502_v27 }
0x1f45   :  { %v3535_v25 = vsel %vm3534_vm3, %v3533_v22, %v2356_v0  ;;  %v2380_v5 = vmul.f32 %v5288_v21, %v2356_v0  ;;  %vm3565_vm3 = vcmask 154624  }
0x1f46   :  { %v2771_v15 = vpop.xlane.xlu1 %2770  ;;  %v3505_v2 = vrot.slane %v3504_v40, 2 }
0x1f47   :  { %v2772_v59 = vsub.f32 0.0, %v2771_v15  ;;  %v2381_v61 = vadd.f32 %v2380_v5, %v1965_v6 }
0x1f48   :  { %v3506_v7 = vadd.f32 %v3505_v2, %v3504_v40 }
0x1f49   :  { %v2796_v18 = vmul.f32 %v5295_v60, %v2772_v59  ;;  %v3537_v4 = vsel %vm3536_vm14, %v3535_v25, %v2772_v59  ;;  %v1707_v60 = vcvt.s32.f32 %v4871_v31  ;;  %vm3567_vm14 = vcmask 162816  }
0x1f4a   :  { %v3187_v8 = vpop.xlane.xlu1 %3186 }
0x1f4b   :  { %v3188_v26 = vsub.f32 0.0, %v3187_v8  ;;  %v2797_v62 = vadd.f32 %v2796_v18, %v2381_v61 }
0x1f4d   :  { %v3212_v16 = vmul.f32 %v5313_v36, %v3188_v26  ;;  %v3539_v21 = vsel %vm3538_vm10, %v3537_v4, %v3188_v26  ;;  %v2955_v36 = vcvt.s32.f32 %v5063_v46 }
0x1f4e   :  { %v3541_v42 = vsel %vm3540_vm5, %v3539_v21, %v459_v41 }
0x1f4f   :  { %v3543_v44 = vsel %vm3542_vm0, %v3541_v42, %v875_v32  ;;  %v3213_v45 = vadd.f32 %v3212_v16, %v2797_v62 }
0x1f50   :  { %v3545_v23 = vsel %vm3544_vm7, %v3543_v44, %v1291_v33 }
0x1f51   :  { %v3484_v34 = vmul.f32 %v4523_v17, %v3213_v45  ;;  %v3547_v37 = vsel %vm3546_vm8, %v3545_v23, %v1707_v60 }
0x1f52   :  { %v3549_v55 = vsel %vm3548_vm4, %v3547_v37, %v2123_v53 }
0x1f53   :  { %v3486_v31 = vsel %vm3485_vm11, %v3484_v34, 0.0  ;;  %v3551_v52 = vsel %vm3550_vm9, %v3549_v55, %v2539_v20 }
0x1f54   :  { %3487 = vadd.xlane.f32.xlu1 %v3486_v31  ;;  %v3553_v54 = vsel %vm3552_vm2, %v3551_v52, %v2955_v36 }
0x1f55   :  { %v5371_v35 = vsel %vm3554_vm12, %v3553_v54, %v3366_v50 }
0x1fca   :  { %v3461_v10 = vpop.xlane.xlu1 %3460 }
0x1fcb   :  { %v3462_v1 = vsub.f32 0.0, %v3461_v10 }
0x1fcd   :  { %v3511_v58 = vmul.f32 %v3462_v1, %v5324_v63  ;;  %v3560_v46 = vsel %vm43_vm1, %v5211_v24, %v3462_v1  ;;  %v3507_v24 = vrot.slane %v3506_v7, 1 }
0x1fce   :  { %v3471_v38 = vpop.xlane.xlu1 %3470 }
0x1fcf   :  { %v3512_v14 = vsel %vm3485_vm11, %v3511_v58, 0.0  ;;  %vm3472_vm6 = vcmp.eq.f32.partialorder %v5351_v12, %v3471_v38  ;;  %v3508_v51 = vadd.f32 %v3507_v24, %v3506_v7  ;;  %v3477_v0 = vcvt.f32.s32 %v3471_v38 }
0x1fd0   :  { %3513 = vadd.xlane.f32.xlu1 %v3512_v14  ;;  %v3473_v48 = vsel %vm3472_vm6, %v3468_v49, inf }
0x1fd1   :  { %v3478_v15 = vshll.u32 %v3477_v0, 16 }
0x1fd4   :  { %3474 = vmin.xlane.f32.xlu1 %v3473_v48 }
0x1fe1   :  { %v3488_v29 = vpop.xlane.xlu1 %3487 }
0x1fe2   :  { %v3489_v63 = vrot.slane %v3488_v29, 4 }
0x1fe4   :  { %v3490_v43 = vadd.f32 %v3489_v63, %v3488_v29 }
0x1fe6   :  { %v3491_v57 = vrot.slane %v3490_v43, 2 }
0x1fe8   :  { %v3492_v22 = vadd.f32 %v3491_v57, %v3490_v43 }
0x1fea   :  { %v3493_v28 = vrot.slane %v3492_v22, 1 }
0x1fec   :  { %v3494_v13 = vadd.f32 %v3493_v28, %v3492_v22 }
0x1fee   :  { %4424 = vpush %v3494_v13 }
0x1fef   :  { %4426 = vpush %v3508_v51 }
0x201f   :  { %s4425_s7 = spop %4424 }
0x2020   :  { %s4427_s8 = spop %4426  ;;  %s3496_s11 = smul.f32 0.125, %s4425_s7 }
0x2021   :  { %s3510_s12 = smul.f32 0.125, %s4427_s8 }
0x2022   :  { %s3497_s14 = smul.f32 0.1, %s3496_s11 }
0x205d   :  { %v3514_v12 = vpop.xlane.xlu1 %3513 }
0x205e   :  { %v3515_v9 = vrot.slane %v3514_v12, 4 }
0x2060   :  { %v3516_v30 = vadd.f32 %v3515_v9, %v3514_v12 }
0x2061   :  { %v3475_v25 = vpop.xlane.xlu1 %3474 }
0x2062   :  { %v3517_v56 = vrot.slane %v3516_v30, 2  ;;  %v3476_v5 = vcvt.f32.s32 %v3475_v25 }
0x2064   :  { %v3479_v59 = vadd.s32 %v3478_v15, %v3476_v5  ;;  %v3518_v6 = vadd.f32 %v3517_v56, %v3516_v30 }
0x2066   :  { %vm3480_vm11 = vcmp.eq.s32.totalorder %v3479_v59, %v5234_v47  ;;  %v3519_v18 = vrot.slane %v3518_v6, 1 }
0x2067   :  { %v3635_v4 = vsel %vm3480_vm11, 1.0, %v4526_v3 }
0x2068   :  { %3557 = vrot.lane.b32.xlu1 %v3635_v4, %s4529_s1  ;;  %v3520_v8 = vadd.f32 %v3519_v18, %v3518_v6 }
0x206a   :  { %4428 = vpush %v3520_v8 }
0x209b   :  { %s4429_s9 = spop %4428 }
0x209c   :  { %s3522_s10 = smul.f32 0.125, %s4429_s9 }
0x209e   :  { %s3523_s13 = sadd.f32 %s3522_s10, %s3510_s12 }
0x20a0   :  { %s3524_s15 = ssub.f32 %s3523_s13, %s3497_s14 }
0x20a2   :  { %v3525_v3 = vstv %s3524_s15 }
0x20da   :  { %v3558_v61 = vpop.permute.xlu1 %3557 }
0x20db   :  { %v3562_v47 = vsel %vm3561_vm15, %v3560_v46, %v3558_v61 }
0x20dc   :  { %v3564_v26 = vsel %vm3563_vm13, %v3562_v47, %v5319_v19 }
0x20dd   :  { %v3566_v41 = vsel %vm3565_vm3, %v3564_v26, %v3525_v3 }
0x20de   :  { %v3568_v32 = vsel %vm3567_vm14, %v3566_v41, 0.0 }
0x20df   :  { %3570 = vrot.lane.b32.xlu1 %v3568_v32, %s4530_s16 }
0x2151   :  { %v3571_v62 = vpop.permute.xlu1 %3570 }
0x2152   :  { %v3573_v16 = vsel %vm43_vm1, %v5371_v35, %v3571_v62 }
0x2153   :  { %3574 = vst [vmem:[%s5391_s4] sm:$0xff] %v3573_v16 }

</bundles_post_ra>
